<compile_context>
chip_gen: v7x
topology: tpu7x:2x2x1
jax: 0.10.0
libtpu: 0.0.40
codegen_flags: <defaults>
</compile_context>

<pallas_src>
import functools

import jax
import jax.numpy as jnp
import numpy as np
from jax.experimental import pallas as pl
from jax.experimental.pallas import tpu as pltpu


def _tdconv_kernel(x_ref, w_ref, m_ref, o_ref, *, Nb, H, W, C_out, KH, KW):
    """One grid step = Nb frames.

    x_ref: (Nb, C_in, H*W)        input frames, flat spatial on the lane axis
    w_ref: (KH*KW*C_out, C_in)    weight rows, grouped tap-major
    m_ref: (KH*KW, 1, H*W)        per-tap 0/1 zero-padding masks
    o_ref: (Nb, C_out, H*W)       output frames (lane-dense stores)
    """
    HW = H * W
    ph, pw = (KH - 1) // 2, (KW - 1) // 2
    w_all = w_ref[...]                                   # tiny, stays resident

    for n in range(Nb):                                  # frames in this block
        xf = x_ref[n]                                    # (C_in, HW), lane-dense RHS
        # All taps x all output channels in a single MXU matmul.
        z = jnp.dot(w_all, xf,
                    preferred_element_type=jnp.float32)  # (KH*KW*C_out, HW)
        acc = jnp.zeros((C_out, HW), jnp.float32)
        for t in range(KH * KW):
            kh, kw = divmod(t, KW)
            dh, dw = kh - ph, kw - pw
            off = dh * W + dw                            # flat-spatial shift of this tap
            zt = z[t * C_out:(t + 1) * C_out, :]
            if off != 0:
                # out[p] = zt[p + off]  (XLU lane rotate; wrapped lanes masked below)
                zt = pltpu.roll(zt, shift=(-off) % HW, axis=1)
            acc = acc + zt * m_ref[t]                    # (1, HW) mask broadcasts over C_out
        o_ref[n] = acc.astype(o_ref.dtype)


def _pick_block_frames(n, max_frames=8):
    """Largest divisor of n that is <= max_frames while keeping >= 2 grid steps
    (so both TensorCores get work on v7x)."""
    best = 1
    for cand in range(2, min(n, max_frames) + 1):
        if n % cand == 0 and n // cand >= 2:
            best = cand
    return best


def time_distributed_conv2d(x, weight, *, compute_dtype=None):
    """x: (B, T, C_in, H, W); weight: (C_out, C_in, KH, KW)  (PyTorch layouts).

    compute_dtype: optionally jnp.bfloat16 on v6e/v7x (accumulation stays f32).
    """
    B, T, C_in, H, W = x.shape
    C_out, c_in_w, KH, KW = weight.shape
    assert C_in == c_in_w
    # padding=(K-1)//2 reproduces the module's padding=1 only for odd kernels
    assert KH % 2 == 1 and KW % 2 == 1, "odd kernel sizes only"
    N, HW = B * T, H * W
    ph, pw = (KH - 1) // 2, (KW - 1) // 2

    # Pure reshapes of the PyTorch NCHW tensors -- no transpose / pad HBM passes.
    x2 = x.reshape(N, C_in, HW)
    # (C_out, C_in, KH, KW) -> (KH*KW*C_out, C_in), rows grouped tap-major.
    w2 = jnp.transpose(weight, (2, 3, 0, 1)).reshape(KH * KW * C_out, C_in)
    if compute_dtype is not None:
        x2, w2 = x2.astype(compute_dtype), w2.astype(compute_dtype)

    # Per-tap validity masks over flattened spatial positions (the zero padding).
    hh, ww = np.divmod(np.arange(HW), W)
    masks = np.empty((KH * KW, 1, HW), np.float32)
    for t in range(KH * KW):
        kh, kw = divmod(t, KW)
        dh, dw = kh - ph, kw - pw
        masks[t, 0, :] = ((hh + dh >= 0) & (hh + dh < H) &
                          (ww + dw >= 0) & (ww + dw < W)).astype(np.float32)
    masks = jnp.asarray(masks)

    Nb = _pick_block_frames(N)
    kernel = functools.partial(_tdconv_kernel, Nb=Nb, H=H, W=W,
                               C_out=C_out, KH=KH, KW=KW)

    y2 = pl.pallas_call(
        kernel,
        out_shape=jax.ShapeDtypeStruct((N, C_out, HW), x.dtype),
        grid_spec=pltpu.PrefetchScalarGridSpec(
            num_scalar_prefetch=0,
            grid=(N // Nb,),
            in_specs=[
                pl.BlockSpec((Nb, C_in, HW), lambda i: (i, 0, 0)),
                pl.BlockSpec((KH * KW * C_out, C_in), lambda i: (0, 0)),
                pl.BlockSpec((KH * KW, 1, HW), lambda i: (0, 0, 0)),
            ],
            out_specs=pl.BlockSpec((Nb, C_out, HW), lambda i: (i, 0, 0)),
        ),
        compiler_params=pltpu.CompilerParams(
            dimension_semantics=("parallel",)),
    )(x2, w2, masks)

    # (N, C_out, H*W) is already NCHW-flat: the final view back is free.
    return y2.reshape(B, T, C_out, H, W)


if __name__ == "__main__":
    # TODO(synk): the `len(x.size()) <= 2` branch of the PyTorch forward (feeding a
    # <=2D tensor straight into Conv2d) and the optional dropout=True path are not
    # implemented; only the 5D conv path is.
    B, T, C_in, C_out, H, W = 2, 4, 4, 8, 16, 16

    key = jax.random.PRNGKey(0)
    kx, kw = jax.random.split(key)
    x = jax.random.normal(kx, (B, T, C_in, H, W), dtype=jnp.float32)
    # deterministic synthetic weights (Conv2d(C_in, C_out, 3, 3), bias=False)
    weight = jax.random.normal(kw, (C_out, C_in, 3, 3), dtype=jnp.float32) * 0.1

    y = jax.block_until_ready(time_distributed_conv2d(x, weight))
    assert y.shape == (B, T, C_out, H, W)

    # reference check against XLA conv (silent on success)
    y_ref = jax.lax.conv_general_dilated(
        x.reshape(B * T, C_in, H, W), weight, window_strides=(1, 1),
        padding="SAME", dimension_numbers=("NCHW", "OIHW", "NCHW"),
    ).reshape(B, T, C_out, H, W)
    np.testing.assert_allclose(np.asarray(y), np.asarray(y_ref),
                               rtol=1e-3, atol=1e-3)

    print("KERNEL_OK")
</pallas_src>

<mosaic_0001>
module attributes {stable_mosaic.version = 11 : i64} {
  func.func @_tdconv_kernel(%arg0: i32, %arg1: memref<4x4x256xf32, #tpu.memory_space<vmem>>, %arg2: memref<72x4xf32, #tpu.memory_space<vmem>>, %arg3: memref<9x1x256xf32, #tpu.memory_space<vmem>>, %arg4: memref<4x8x256xf32, #tpu.memory_space<vmem>>) attributes {dimension_semantics = [#tpu.dimension_semantics<parallel>], iteration_bounds = array<i64: 2>, scalar_prefetch = 0 : i64, scratch_operands = 0 : i64, tpu.core_type = #tpu.core_type<tc>, window_params = [{transform_indices = @transform_0, window_bounds = array<i64: 4, 4, 256>}, {pipeline_mode = #tpu.pipeline_mode<synchronous>, transform_indices = @transform_1, window_bounds = array<i64: 72, 4>}, {pipeline_mode = #tpu.pipeline_mode<synchronous>, transform_indices = @transform_2, window_bounds = array<i64: 9, 1, 256>}, {transform_indices = @transform_3, window_bounds = array<i64: 4, 8, 256>}]} {
    %c0 = arith.constant 0 : index
    %c0_0 = arith.constant 0 : index
    %0 = vector.load %arg2[%c0, %c0_0] : memref<72x4xf32, #tpu.memory_space<vmem>>, vector<72x4xf32>
    %c0_1 = arith.constant 0 : index
    %c0_2 = arith.constant 0 : index
    %c0_3 = arith.constant 0 : index
    %1 = vector.load %arg1[%c0_1, %c0_2, %c0_3] : memref<4x4x256xf32, #tpu.memory_space<vmem>>, vector<1x4x256xf32>
    %2 = vector.shape_cast %1 : vector<1x4x256xf32> to vector<4x256xf32>
    %cst = arith.constant dense<0.000000e+00> : vector<72x256xf32>
    %3 = tpu.matmul %0, %2, %cst {dimension_numbers = #tpu.dot_dimension_numbers<[1], [0], [0], [1], [0, 0, 1, 1], [], []>} : vector<72x4xf32>, vector<4x256xf32>, vector<72x256xf32> -> vector<72x256xf32>
    %cst_4 = arith.constant 0.000000e+00 : f32
    %4 = vector.broadcast %cst_4 : f32 to vector<8x256xf32>
    %5 = vector.extract_strided_slice %3 {offsets = [0, 0], sizes = [8, 256], strides = [1, 1]} : vector<72x256xf32> to vector<8x256xf32>
    %c17_i32 = arith.constant 17 : i32
    %6 = tpu.dynamic_rotate %5 by %c17_i32 dim 1 : vector<8x256xf32>, i32 -> vector<8x256xf32>
    %c0_5 = arith.constant 0 : index
    %c0_6 = arith.constant 0 : index
    %c0_7 = arith.constant 0 : index
    %7 = vector.load %arg3[%c0_5, %c0_6, %c0_7] : memref<9x1x256xf32, #tpu.memory_space<vmem>>, vector<1x1x256xf32>
    %8 = vector.shape_cast %7 : vector<1x1x256xf32> to vector<1x256xf32>
    %9 = vector.broadcast %8 : vector<1x256xf32> to vector<8x256xf32>
    %10 = arith.mulf %6, %9 : vector<8x256xf32>
    %11 = arith.addf %4, %10 : vector<8x256xf32>
    %12 = vector.extract_strided_slice %3 {offsets = [8, 0], sizes = [8, 256], strides = [1, 1]} : vector<72x256xf32> to vector<8x256xf32>
    %c16_i32 = arith.constant 16 : i32
    %13 = tpu.dynamic_rotate %12 by %c16_i32 dim 1 : vector<8x256xf32>, i32 -> vector<8x256xf32>
    %c1 = arith.constant 1 : index
    %c0_8 = arith.constant 0 : index
    %c0_9 = arith.constant 0 : index
    %14 = vector.load %arg3[%c1, %c0_8, %c0_9] : memref<9x1x256xf32, #tpu.memory_space<vmem>>, vector<1x1x256xf32>
    %15 = vector.shape_cast %14 : vector<1x1x256xf32> to vector<1x256xf32>
    %16 = vector.broadcast %15 : vector<1x256xf32> to vector<8x256xf32>
    %17 = arith.mulf %13, %16 : vector<8x256xf32>
    %18 = arith.addf %11, %17 : vector<8x256xf32>
    %19 = vector.extract_strided_slice %3 {offsets = [16, 0], sizes = [8, 256], strides = [1, 1]} : vector<72x256xf32> to vector<8x256xf32>
    %c15_i32 = arith.constant 15 : i32
    %20 = tpu.dynamic_rotate %19 by %c15_i32 dim 1 : vector<8x256xf32>, i32 -> vector<8x256xf32>
    %c2 = arith.constant 2 : index
    %c0_10 = arith.constant 0 : index
    %c0_11 = arith.constant 0 : index
    %21 = vector.load %arg3[%c2, %c0_10, %c0_11] : memref<9x1x256xf32, #tpu.memory_space<vmem>>, vector<1x1x256xf32>
    %22 = vector.shape_cast %21 : vector<1x1x256xf32> to vector<1x256xf32>
    %23 = vector.broadcast %22 : vector<1x256xf32> to vector<8x256xf32>
    %24 = arith.mulf %20, %23 : vector<8x256xf32>
    %25 = arith.addf %18, %24 : vector<8x256xf32>
    %26 = vector.extract_strided_slice %3 {offsets = [24, 0], sizes = [8, 256], strides = [1, 1]} : vector<72x256xf32> to vector<8x256xf32>
    %c1_i32 = arith.constant 1 : i32
    %27 = tpu.dynamic_rotate %26 by %c1_i32 dim 1 : vector<8x256xf32>, i32 -> vector<8x256xf32>
    %c3 = arith.constant 3 : index
    %c0_12 = arith.constant 0 : index
    %c0_13 = arith.constant 0 : index
    %28 = vector.load %arg3[%c3, %c0_12, %c0_13] : memref<9x1x256xf32, #tpu.memory_space<vmem>>, vector<1x1x256xf32>
    %29 = vector.shape_cast %28 : vector<1x1x256xf32> to vector<1x256xf32>
    %30 = vector.broadcast %29 : vector<1x256xf32> to vector<8x256xf32>
    %31 = arith.mulf %27, %30 : vector<8x256xf32>
    %32 = arith.addf %25, %31 : vector<8x256xf32>
    %33 = vector.extract_strided_slice %3 {offsets = [32, 0], sizes = [8, 256], strides = [1, 1]} : vector<72x256xf32> to vector<8x256xf32>
    %c4 = arith.constant 4 : index
    %c0_14 = arith.constant 0 : index
    %c0_15 = arith.constant 0 : index
    %34 = vector.load %arg3[%c4, %c0_14, %c0_15] : memref<9x1x256xf32, #tpu.memory_space<vmem>>, vector<1x1x256xf32>
    %35 = vector.shape_cast %34 : vector<1x1x256xf32> to vector<1x256xf32>
    %36 = vector.broadcast %35 : vector<1x256xf32> to vector<8x256xf32>
    %37 = arith.mulf %33, %36 : vector<8x256xf32>
    %38 = arith.addf %32, %37 : vector<8x256xf32>
    %39 = vector.extract_strided_slice %3 {offsets = [40, 0], sizes = [8, 256], strides = [1, 1]} : vector<72x256xf32> to vector<8x256xf32>
    %c255_i32 = arith.constant 255 : i32
    %40 = tpu.dynamic_rotate %39 by %c255_i32 dim 1 : vector<8x256xf32>, i32 -> vector<8x256xf32>
    %c5 = arith.constant 5 : index
    %c0_16 = arith.constant 0 : index
    %c0_17 = arith.constant 0 : index
    %41 = vector.load %arg3[%c5, %c0_16, %c0_17] : memref<9x1x256xf32, #tpu.memory_space<vmem>>, vector<1x1x256xf32>
    %42 = vector.shape_cast %41 : vector<1x1x256xf32> to vector<1x256xf32>
    %43 = vector.broadcast %42 : vector<1x256xf32> to vector<8x256xf32>
    %44 = arith.mulf %40, %43 : vector<8x256xf32>
    %45 = arith.addf %38, %44 : vector<8x256xf32>
    %46 = vector.extract_strided_slice %3 {offsets = [48, 0], sizes = [8, 256], strides = [1, 1]} : vector<72x256xf32> to vector<8x256xf32>
    %c241_i32 = arith.constant 241 : i32
    %47 = tpu.dynamic_rotate %46 by %c241_i32 dim 1 : vector<8x256xf32>, i32 -> vector<8x256xf32>
    %c6 = arith.constant 6 : index
    %c0_18 = arith.constant 0 : index
    %c0_19 = arith.constant 0 : index
    %48 = vector.load %arg3[%c6, %c0_18, %c0_19] : memref<9x1x256xf32, #tpu.memory_space<vmem>>, vector<1x1x256xf32>
    %49 = vector.shape_cast %48 : vector<1x1x256xf32> to vector<1x256xf32>
    %50 = vector.broadcast %49 : vector<1x256xf32> to vector<8x256xf32>
    %51 = arith.mulf %47, %50 : vector<8x256xf32>
    %52 = arith.addf %45, %51 : vector<8x256xf32>
    %53 = vector.extract_strided_slice %3 {offsets = [56, 0], sizes = [8, 256], strides = [1, 1]} : vector<72x256xf32> to vector<8x256xf32>
    %c240_i32 = arith.constant 240 : i32
    %54 = tpu.dynamic_rotate %53 by %c240_i32 dim 1 : vector<8x256xf32>, i32 -> vector<8x256xf32>
    %c7 = arith.constant 7 : index
    %c0_20 = arith.constant 0 : index
    %c0_21 = arith.constant 0 : index
    %55 = vector.load %arg3[%c7, %c0_20, %c0_21] : memref<9x1x256xf32, #tpu.memory_space<vmem>>, vector<1x1x256xf32>
    %56 = vector.shape_cast %55 : vector<1x1x256xf32> to vector<1x256xf32>
    %57 = vector.broadcast %56 : vector<1x256xf32> to vector<8x256xf32>
    %58 = arith.mulf %54, %57 : vector<8x256xf32>
    %59 = arith.addf %52, %58 : vector<8x256xf32>
    %60 = vector.extract_strided_slice %3 {offsets = [64, 0], sizes = [8, 256], strides = [1, 1]} : vector<72x256xf32> to vector<8x256xf32>
    %c239_i32 = arith.constant 239 : i32
    %61 = tpu.dynamic_rotate %60 by %c239_i32 dim 1 : vector<8x256xf32>, i32 -> vector<8x256xf32>
    %c8 = arith.constant 8 : index
    %c0_22 = arith.constant 0 : index
    %c0_23 = arith.constant 0 : index
    %62 = vector.load %arg3[%c8, %c0_22, %c0_23] : memref<9x1x256xf32, #tpu.memory_space<vmem>>, vector<1x1x256xf32>
    %63 = vector.shape_cast %62 : vector<1x1x256xf32> to vector<1x256xf32>
    %64 = vector.broadcast %63 : vector<1x256xf32> to vector<8x256xf32>
    %65 = arith.mulf %61, %64 : vector<8x256xf32>
    %66 = arith.addf %59, %65 : vector<8x256xf32>
    %c0_24 = arith.constant 0 : index
    %c0_25 = arith.constant 0 : index
    %c0_26 = arith.constant 0 : index
    %67 = vector.load %arg4[%c0_24, %c0_25, %c0_26] : memref<4x8x256xf32, #tpu.memory_space<vmem>>, vector<1x8x256xf32>
    %68 = vector.shape_cast %67 : vector<1x8x256xf32> to vector<8x256xf32>
    %69 = vector.shape_cast %66 : vector<8x256xf32> to vector<1x8x256xf32>
    tpu.vector_store %arg4[%c0_24, %c0_25, %c0_26], %69 {strides = array<i32>} : memref<4x8x256xf32, #tpu.memory_space<vmem>>, vector<1x8x256xf32>,
    %c1_27 = arith.constant 1 : index
    %c0_28 = arith.constant 0 : index
    %c0_29 = arith.constant 0 : index
    %70 = vector.load %arg1[%c1_27, %c0_28, %c0_29] : memref<4x4x256xf32, #tpu.memory_space<vmem>>, vector<1x4x256xf32>
    %71 = vector.shape_cast %70 : vector<1x4x256xf32> to vector<4x256xf32>
    %cst_30 = arith.constant dense<0.000000e+00> : vector<72x256xf32>
    %72 = tpu.matmul %0, %71, %cst_30 {dimension_numbers = #tpu.dot_dimension_numbers<[1], [0], [0], [1], [0, 0, 1, 1], [], []>} : vector<72x4xf32>, vector<4x256xf32>, vector<72x256xf32> -> vector<72x256xf32>
    %cst_31 = arith.constant 0.000000e+00 : f32
    %73 = vector.broadcast %cst_31 : f32 to vector<8x256xf32>
    %74 = vector.extract_strided_slice %72 {offsets = [0, 0], sizes = [8, 256], strides = [1, 1]} : vector<72x256xf32> to vector<8x256xf32>
    %c17_i32_32 = arith.constant 17 : i32
    %75 = tpu.dynamic_rotate %74 by %c17_i32_32 dim 1 : vector<8x256xf32>, i32 -> vector<8x256xf32>
    %c0_33 = arith.constant 0 : index
    %c0_34 = arith.constant 0 : index
    %c0_35 = arith.constant 0 : index
    %76 = vector.load %arg3[%c0_33, %c0_34, %c0_35] : memref<9x1x256xf32, #tpu.memory_space<vmem>>, vector<1x1x256xf32>
    %77 = vector.shape_cast %76 : vector<1x1x256xf32> to vector<1x256xf32>
    %78 = vector.broadcast %77 : vector<1x256xf32> to vector<8x256xf32>
    %79 = arith.mulf %75, %78 : vector<8x256xf32>
    %80 = arith.addf %73, %79 : vector<8x256xf32>
    %81 = vector.extract_strided_slice %72 {offsets = [8, 0], sizes = [8, 256], strides = [1, 1]} : vector<72x256xf32> to vector<8x256xf32>
    %c16_i32_36 = arith.constant 16 : i32
    %82 = tpu.dynamic_rotate %81 by %c16_i32_36 dim 1 : vector<8x256xf32>, i32 -> vector<8x256xf32>
    %c1_37 = arith.constant 1 : index
    %c0_38 = arith.constant 0 : index
    %c0_39 = arith.constant 0 : index
    %83 = vector.load %arg3[%c1_37, %c0_38, %c0_39] : memref<9x1x256xf32, #tpu.memory_space<vmem>>, vector<1x1x256xf32>
    %84 = vector.shape_cast %83 : vector<1x1x256xf32> to vector<1x256xf32>
    %85 = vector.broadcast %84 : vector<1x256xf32> to vector<8x256xf32>
    %86 = arith.mulf %82, %85 : vector<8x256xf32>
    %87 = arith.addf %80, %86 : vector<8x256xf32>
    %88 = vector.extract_strided_slice %72 {offsets = [16, 0], sizes = [8, 256], strides = [1, 1]} : vector<72x256xf32> to vector<8x256xf32>
    %c15_i32_40 = arith.constant 15 : i32
    %89 = tpu.dynamic_rotate %88 by %c15_i32_40 dim 1 : vector<8x256xf32>, i32 -> vector<8x256xf32>
    %c2_41 = arith.constant 2 : index
    %c0_42 = arith.constant 0 : index
    %c0_43 = arith.constant 0 : index
    %90 = vector.load %arg3[%c2_41, %c0_42, %c0_43] : memref<9x1x256xf32, #tpu.memory_space<vmem>>, vector<1x1x256xf32>
    %91 = vector.shape_cast %90 : vector<1x1x256xf32> to vector<1x256xf32>
    %92 = vector.broadcast %91 : vector<1x256xf32> to vector<8x256xf32>
    %93 = arith.mulf %89, %92 : vector<8x256xf32>
    %94 = arith.addf %87, %93 : vector<8x256xf32>
    %95 = vector.extract_strided_slice %72 {offsets = [24, 0], sizes = [8, 256], strides = [1, 1]} : vector<72x256xf32> to vector<8x256xf32>
    %c1_i32_44 = arith.constant 1 : i32
    %96 = tpu.dynamic_rotate %95 by %c1_i32_44 dim 1 : vector<8x256xf32>, i32 -> vector<8x256xf32>
    %c3_45 = arith.constant 3 : index
    %c0_46 = arith.constant 0 : index
    %c0_47 = arith.constant 0 : index
    %97 = vector.load %arg3[%c3_45, %c0_46, %c0_47] : memref<9x1x256xf32, #tpu.memory_space<vmem>>, vector<1x1x256xf32>
    %98 = vector.shape_cast %97 : vector<1x1x256xf32> to vector<1x256xf32>
    %99 = vector.broadcast %98 : vector<1x256xf32> to vector<8x256xf32>
    %100 = arith.mulf %96, %99 : vector<8x256xf32>
    %101 = arith.addf %94, %100 : vector<8x256xf32>
    %102 = vector.extract_strided_slice %72 {offsets = [32, 0], sizes = [8, 256], strides = [1, 1]} : vector<72x256xf32> to vector<8x256xf32>
    %c4_48 = arith.constant 4 : index
    %c0_49 = arith.constant 0 : index
    %c0_50 = arith.constant 0 : index
    %103 = vector.load %arg3[%c4_48, %c0_49, %c0_50] : memref<9x1x256xf32, #tpu.memory_space<vmem>>, vector<1x1x256xf32>
    %104 = vector.shape_cast %103 : vector<1x1x256xf32> to vector<1x256xf32>
    %105 = vector.broadcast %104 : vector<1x256xf32> to vector<8x256xf32>
    %106 = arith.mulf %102, %105 : vector<8x256xf32>
    %107 = arith.addf %101, %106 : vector<8x256xf32>
    %108 = vector.extract_strided_slice %72 {offsets = [40, 0], sizes = [8, 256], strides = [1, 1]} : vector<72x256xf32> to vector<8x256xf32>
    %c255_i32_51 = arith.constant 255 : i32
    %109 = tpu.dynamic_rotate %108 by %c255_i32_51 dim 1 : vector<8x256xf32>, i32 -> vector<8x256xf32>
    %c5_52 = arith.constant 5 : index
    %c0_53 = arith.constant 0 : index
    %c0_54 = arith.constant 0 : index
    %110 = vector.load %arg3[%c5_52, %c0_53, %c0_54] : memref<9x1x256xf32, #tpu.memory_space<vmem>>, vector<1x1x256xf32>
    %111 = vector.shape_cast %110 : vector<1x1x256xf32> to vector<1x256xf32>
    %112 = vector.broadcast %111 : vector<1x256xf32> to vector<8x256xf32>
    %113 = arith.mulf %109, %112 : vector<8x256xf32>
    %114 = arith.addf %107, %113 : vector<8x256xf32>
    %115 = vector.extract_strided_slice %72 {offsets = [48, 0], sizes = [8, 256], strides = [1, 1]} : vector<72x256xf32> to vector<8x256xf32>
    %c241_i32_55 = arith.constant 241 : i32
    %116 = tpu.dynamic_rotate %115 by %c241_i32_55 dim 1 : vector<8x256xf32>, i32 -> vector<8x256xf32>
    %c6_56 = arith.constant 6 : index
    %c0_57 = arith.constant 0 : index
    %c0_58 = arith.constant 0 : index
    %117 = vector.load %arg3[%c6_56, %c0_57, %c0_58] : memref<9x1x256xf32, #tpu.memory_space<vmem>>, vector<1x1x256xf32>
    %118 = vector.shape_cast %117 : vector<1x1x256xf32> to vector<1x256xf32>
    %119 = vector.broadcast %118 : vector<1x256xf32> to vector<8x256xf32>
    %120 = arith.mulf %116, %119 : vector<8x256xf32>
    %121 = arith.addf %114, %120 : vector<8x256xf32>
    %122 = vector.extract_strided_slice %72 {offsets = [56, 0], sizes = [8, 256], strides = [1, 1]} : vector<72x256xf32> to vector<8x256xf32>
    %c240_i32_59 = arith.constant 240 : i32
    %123 = tpu.dynamic_rotate %122 by %c240_i32_59 dim 1 : vector<8x256xf32>, i32 -> vector<8x256xf32>
    %c7_60 = arith.constant 7 : index
    %c0_61 = arith.constant 0 : index
    %c0_62 = arith.constant 0 : index
    %124 = vector.load %arg3[%c7_60, %c0_61, %c0_62] : memref<9x1x256xf32, #tpu.memory_space<vmem>>, vector<1x1x256xf32>
    %125 = vector.shape_cast %124 : vector<1x1x256xf32> to vector<1x256xf32>
    %126 = vector.broadcast %125 : vector<1x256xf32> to vector<8x256xf32>
    %127 = arith.mulf %123, %126 : vector<8x256xf32>
    %128 = arith.addf %121, %127 : vector<8x256xf32>
    %129 = vector.extract_strided_slice %72 {offsets = [64, 0], sizes = [8, 256], strides = [1, 1]} : vector<72x256xf32> to vector<8x256xf32>
    %c239_i32_63 = arith.constant 239 : i32
    %130 = tpu.dynamic_rotate %129 by %c239_i32_63 dim 1 : vector<8x256xf32>, i32 -> vector<8x256xf32>
    %c8_64 = arith.constant 8 : index
    %c0_65 = arith.constant 0 : index
    %c0_66 = arith.constant 0 : index
    %131 = vector.load %arg3[%c8_64, %c0_65, %c0_66] : memref<9x1x256xf32, #tpu.memory_space<vmem>>, vector<1x1x256xf32>
    %132 = vector.shape_cast %131 : vector<1x1x256xf32> to vector<1x256xf32>
    %133 = vector.broadcast %132 : vector<1x256xf32> to vector<8x256xf32>
    %134 = arith.mulf %130, %133 : vector<8x256xf32>
    %135 = arith.addf %128, %134 : vector<8x256xf32>
    %c1_67 = arith.constant 1 : index
    %c0_68 = arith.constant 0 : index
    %c0_69 = arith.constant 0 : index
    %136 = vector.load %arg4[%c1_67, %c0_68, %c0_69] : memref<4x8x256xf32, #tpu.memory_space<vmem>>, vector<1x8x256xf32>
    %137 = vector.shape_cast %136 : vector<1x8x256xf32> to vector<8x256xf32>
    %138 = vector.shape_cast %135 : vector<8x256xf32> to vector<1x8x256xf32>
    tpu.vector_store %arg4[%c1_67, %c0_68, %c0_69], %138 {strides = array<i32>} : memref<4x8x256xf32, #tpu.memory_space<vmem>>, vector<1x8x256xf32>,
    %c2_70 = arith.constant 2 : index
    %c0_71 = arith.constant 0 : index
    %c0_72 = arith.constant 0 : index
    %139 = vector.load %arg1[%c2_70, %c0_71, %c0_72] : memref<4x4x256xf32, #tpu.memory_space<vmem>>, vector<1x4x256xf32>
    %140 = vector.shape_cast %139 : vector<1x4x256xf32> to vector<4x256xf32>
    %cst_73 = arith.constant dense<0.000000e+00> : vector<72x256xf32>
    %141 = tpu.matmul %0, %140, %cst_73 {dimension_numbers = #tpu.dot_dimension_numbers<[1], [0], [0], [1], [0, 0, 1, 1], [], []>} : vector<72x4xf32>, vector<4x256xf32>, vector<72x256xf32> -> vector<72x256xf32>
    %cst_74 = arith.constant 0.000000e+00 : f32
    %142 = vector.broadcast %cst_74 : f32 to vector<8x256xf32>
    %143 = vector.extract_strided_slice %141 {offsets = [0, 0], sizes = [8, 256], strides = [1, 1]} : vector<72x256xf32> to vector<8x256xf32>
    %c17_i32_75 = arith.constant 17 : i32
    %144 = tpu.dynamic_rotate %143 by %c17_i32_75 dim 1 : vector<8x256xf32>, i32 -> vector<8x256xf32>
    %c0_76 = arith.constant 0 : index
    %c0_77 = arith.constant 0 : index
    %c0_78 = arith.constant 0 : index
    %145 = vector.load %arg3[%c0_76, %c0_77, %c0_78] : memref<9x1x256xf32, #tpu.memory_space<vmem>>, vector<1x1x256xf32>
    %146 = vector.shape_cast %145 : vector<1x1x256xf32> to vector<1x256xf32>
    %147 = vector.broadcast %146 : vector<1x256xf32> to vector<8x256xf32>
    %148 = arith.mulf %144, %147 : vector<8x256xf32>
    %149 = arith.addf %142, %148 : vector<8x256xf32>
    %150 = vector.extract_strided_slice %141 {offsets = [8, 0], sizes = [8, 256], strides = [1, 1]} : vector<72x256xf32> to vector<8x256xf32>
    %c16_i32_79 = arith.constant 16 : i32
    %151 = tpu.dynamic_rotate %150 by %c16_i32_79 dim 1 : vector<8x256xf32>, i32 -> vector<8x256xf32>
    %c1_80 = arith.constant 1 : index
    %c0_81 = arith.constant 0 : index
    %c0_82 = arith.constant 0 : index
    %152 = vector.load %arg3[%c1_80, %c0_81, %c0_82] : memref<9x1x256xf32, #tpu.memory_space<vmem>>, vector<1x1x256xf32>
    %153 = vector.shape_cast %152 : vector<1x1x256xf32> to vector<1x256xf32>
    %154 = vector.broadcast %153 : vector<1x256xf32> to vector<8x256xf32>
    %155 = arith.mulf %151, %154 : vector<8x256xf32>
    %156 = arith.addf %149, %155 : vector<8x256xf32>
    %157 = vector.extract_strided_slice %141 {offsets = [16, 0], sizes = [8, 256], strides = [1, 1]} : vector<72x256xf32> to vector<8x256xf32>
    %c15_i32_83 = arith.constant 15 : i32
    %158 = tpu.dynamic_rotate %157 by %c15_i32_83 dim 1 : vector<8x256xf32>, i32 -> vector<8x256xf32>
    %c2_84 = arith.constant 2 : index
    %c0_85 = arith.constant 0 : index
    %c0_86 = arith.constant 0 : index
    %159 = vector.load %arg3[%c2_84, %c0_85, %c0_86] : memref<9x1x256xf32, #tpu.memory_space<vmem>>, vector<1x1x256xf32>
    %160 = vector.shape_cast %159 : vector<1x1x256xf32> to vector<1x256xf32>
    %161 = vector.broadcast %160 : vector<1x256xf32> to vector<8x256xf32>
    %162 = arith.mulf %158, %161 : vector<8x256xf32>
    %163 = arith.addf %156, %162 : vector<8x256xf32>
    %164 = vector.extract_strided_slice %141 {offsets = [24, 0], sizes = [8, 256], strides = [1, 1]} : vector<72x256xf32> to vector<8x256xf32>
    %c1_i32_87 = arith.constant 1 : i32
    %165 = tpu.dynamic_rotate %164 by %c1_i32_87 dim 1 : vector<8x256xf32>, i32 -> vector<8x256xf32>
    %c3_88 = arith.constant 3 : index
    %c0_89 = arith.constant 0 : index
    %c0_90 = arith.constant 0 : index
    %166 = vector.load %arg3[%c3_88, %c0_89, %c0_90] : memref<9x1x256xf32, #tpu.memory_space<vmem>>, vector<1x1x256xf32>
    %167 = vector.shape_cast %166 : vector<1x1x256xf32> to vector<1x256xf32>
    %168 = vector.broadcast %167 : vector<1x256xf32> to vector<8x256xf32>
    %169 = arith.mulf %165, %168 : vector<8x256xf32>
    %170 = arith.addf %163, %169 : vector<8x256xf32>
    %171 = vector.extract_strided_slice %141 {offsets = [32, 0], sizes = [8, 256], strides = [1, 1]} : vector<72x256xf32> to vector<8x256xf32>
    %c4_91 = arith.constant 4 : index
    %c0_92 = arith.constant 0 : index
    %c0_93 = arith.constant 0 : index
    %172 = vector.load %arg3[%c4_91, %c0_92, %c0_93] : memref<9x1x256xf32, #tpu.memory_space<vmem>>, vector<1x1x256xf32>
    %173 = vector.shape_cast %172 : vector<1x1x256xf32> to vector<1x256xf32>
    %174 = vector.broadcast %173 : vector<1x256xf32> to vector<8x256xf32>
    %175 = arith.mulf %171, %174 : vector<8x256xf32>
    %176 = arith.addf %170, %175 : vector<8x256xf32>
    %177 = vector.extract_strided_slice %141 {offsets = [40, 0], sizes = [8, 256], strides = [1, 1]} : vector<72x256xf32> to vector<8x256xf32>
    %c255_i32_94 = arith.constant 255 : i32
    %178 = tpu.dynamic_rotate %177 by %c255_i32_94 dim 1 : vector<8x256xf32>, i32 -> vector<8x256xf32>
    %c5_95 = arith.constant 5 : index
    %c0_96 = arith.constant 0 : index
    %c0_97 = arith.constant 0 : index
    %179 = vector.load %arg3[%c5_95, %c0_96, %c0_97] : memref<9x1x256xf32, #tpu.memory_space<vmem>>, vector<1x1x256xf32>
    %180 = vector.shape_cast %179 : vector<1x1x256xf32> to vector<1x256xf32>
    %181 = vector.broadcast %180 : vector<1x256xf32> to vector<8x256xf32>
    %182 = arith.mulf %178, %181 : vector<8x256xf32>
    %183 = arith.addf %176, %182 : vector<8x256xf32>
    %184 = vector.extract_strided_slice %141 {offsets = [48, 0], sizes = [8, 256], strides = [1, 1]} : vector<72x256xf32> to vector<8x256xf32>
    %c241_i32_98 = arith.constant 241 : i32
    %185 = tpu.dynamic_rotate %184 by %c241_i32_98 dim 1 : vector<8x256xf32>, i32 -> vector<8x256xf32>
    %c6_99 = arith.constant 6 : index
    %c0_100 = arith.constant 0 : index
    %c0_101 = arith.constant 0 : index
    %186 = vector.load %arg3[%c6_99, %c0_100, %c0_101] : memref<9x1x256xf32, #tpu.memory_space<vmem>>, vector<1x1x256xf32>
    %187 = vector.shape_cast %186 : vector<1x1x256xf32> to vector<1x256xf32>
    %188 = vector.broadcast %187 : vector<1x256xf32> to vector<8x256xf32>
    %189 = arith.mulf %185, %188 : vector<8x256xf32>
    %190 = arith.addf %183, %189 : vector<8x256xf32>
    %191 = vector.extract_strided_slice %141 {offsets = [56, 0], sizes = [8, 256], strides = [1, 1]} : vector<72x256xf32> to vector<8x256xf32>
    %c240_i32_102 = arith.constant 240 : i32
    %192 = tpu.dynamic_rotate %191 by %c240_i32_102 dim 1 : vector<8x256xf32>, i32 -> vector<8x256xf32>
    %c7_103 = arith.constant 7 : index
    %c0_104 = arith.constant 0 : index
    %c0_105 = arith.constant 0 : index
    %193 = vector.load %arg3[%c7_103, %c0_104, %c0_105] : memref<9x1x256xf32, #tpu.memory_space<vmem>>, vector<1x1x256xf32>
    %194 = vector.shape_cast %193 : vector<1x1x256xf32> to vector<1x256xf32>
    %195 = vector.broadcast %194 : vector<1x256xf32> to vector<8x256xf32>
    %196 = arith.mulf %192, %195 : vector<8x256xf32>
    %197 = arith.addf %190, %196 : vector<8x256xf32>
    %198 = vector.extract_strided_slice %141 {offsets = [64, 0], sizes = [8, 256], strides = [1, 1]} : vector<72x256xf32> to vector<8x256xf32>
    %c239_i32_106 = arith.constant 239 : i32
    %199 = tpu.dynamic_rotate %198 by %c239_i32_106 dim 1 : vector<8x256xf32>, i32 -> vector<8x256xf32>
    %c8_107 = arith.constant 8 : index
    %c0_108 = arith.constant 0 : index
    %c0_109 = arith.constant 0 : index
    %200 = vector.load %arg3[%c8_107, %c0_108, %c0_109] : memref<9x1x256xf32, #tpu.memory_space<vmem>>, vector<1x1x256xf32>
    %201 = vector.shape_cast %200 : vector<1x1x256xf32> to vector<1x256xf32>
    %202 = vector.broadcast %201 : vector<1x256xf32> to vector<8x256xf32>
    %203 = arith.mulf %199, %202 : vector<8x256xf32>
    %204 = arith.addf %197, %203 : vector<8x256xf32>
    %c2_110 = arith.constant 2 : index
    %c0_111 = arith.constant 0 : index
    %c0_112 = arith.constant 0 : index
    %205 = vector.load %arg4[%c2_110, %c0_111, %c0_112] : memref<4x8x256xf32, #tpu.memory_space<vmem>>, vector<1x8x256xf32>
    %206 = vector.shape_cast %205 : vector<1x8x256xf32> to vector<8x256xf32>
    %207 = vector.shape_cast %204 : vector<8x256xf32> to vector<1x8x256xf32>
    tpu.vector_store %arg4[%c2_110, %c0_111, %c0_112], %207 {strides = array<i32>} : memref<4x8x256xf32, #tpu.memory_space<vmem>>, vector<1x8x256xf32>,
    %c3_113 = arith.constant 3 : index
    %c0_114 = arith.constant 0 : index
    %c0_115 = arith.constant 0 : index
    %208 = vector.load %arg1[%c3_113, %c0_114, %c0_115] : memref<4x4x256xf32, #tpu.memory_space<vmem>>, vector<1x4x256xf32>
    %209 = vector.shape_cast %208 : vector<1x4x256xf32> to vector<4x256xf32>
    %cst_116 = arith.constant dense<0.000000e+00> : vector<72x256xf32>
    %210 = tpu.matmul %0, %209, %cst_116 {dimension_numbers = #tpu.dot_dimension_numbers<[1], [0], [0], [1], [0, 0, 1, 1], [], []>} : vector<72x4xf32>, vector<4x256xf32>, vector<72x256xf32> -> vector<72x256xf32>
    %cst_117 = arith.constant 0.000000e+00 : f32
    %211 = vector.broadcast %cst_117 : f32 to vector<8x256xf32>
    %212 = vector.extract_strided_slice %210 {offsets = [0, 0], sizes = [8, 256], strides = [1, 1]} : vector<72x256xf32> to vector<8x256xf32>
    %c17_i32_118 = arith.constant 17 : i32
    %213 = tpu.dynamic_rotate %212 by %c17_i32_118 dim 1 : vector<8x256xf32>, i32 -> vector<8x256xf32>
    %c0_119 = arith.constant 0 : index
    %c0_120 = arith.constant 0 : index
    %c0_121 = arith.constant 0 : index
    %214 = vector.load %arg3[%c0_119, %c0_120, %c0_121] : memref<9x1x256xf32, #tpu.memory_space<vmem>>, vector<1x1x256xf32>
    %215 = vector.shape_cast %214 : vector<1x1x256xf32> to vector<1x256xf32>
    %216 = vector.broadcast %215 : vector<1x256xf32> to vector<8x256xf32>
    %217 = arith.mulf %213, %216 : vector<8x256xf32>
    %218 = arith.addf %211, %217 : vector<8x256xf32>
    %219 = vector.extract_strided_slice %210 {offsets = [8, 0], sizes = [8, 256], strides = [1, 1]} : vector<72x256xf32> to vector<8x256xf32>
    %c16_i32_122 = arith.constant 16 : i32
    %220 = tpu.dynamic_rotate %219 by %c16_i32_122 dim 1 : vector<8x256xf32>, i32 -> vector<8x256xf32>
    %c1_123 = arith.constant 1 : index
    %c0_124 = arith.constant 0 : index
    %c0_125 = arith.constant 0 : index
    %221 = vector.load %arg3[%c1_123, %c0_124, %c0_125] : memref<9x1x256xf32, #tpu.memory_space<vmem>>, vector<1x1x256xf32>
    %222 = vector.shape_cast %221 : vector<1x1x256xf32> to vector<1x256xf32>
    %223 = vector.broadcast %222 : vector<1x256xf32> to vector<8x256xf32>
    %224 = arith.mulf %220, %223 : vector<8x256xf32>
    %225 = arith.addf %218, %224 : vector<8x256xf32>
    %226 = vector.extract_strided_slice %210 {offsets = [16, 0], sizes = [8, 256], strides = [1, 1]} : vector<72x256xf32> to vector<8x256xf32>
    %c15_i32_126 = arith.constant 15 : i32
    %227 = tpu.dynamic_rotate %226 by %c15_i32_126 dim 1 : vector<8x256xf32>, i32 -> vector<8x256xf32>
    %c2_127 = arith.constant 2 : index
    %c0_128 = arith.constant 0 : index
    %c0_129 = arith.constant 0 : index
    %228 = vector.load %arg3[%c2_127, %c0_128, %c0_129] : memref<9x1x256xf32, #tpu.memory_space<vmem>>, vector<1x1x256xf32>
    %229 = vector.shape_cast %228 : vector<1x1x256xf32> to vector<1x256xf32>
    %230 = vector.broadcast %229 : vector<1x256xf32> to vector<8x256xf32>
    %231 = arith.mulf %227, %230 : vector<8x256xf32>
    %232 = arith.addf %225, %231 : vector<8x256xf32>
    %233 = vector.extract_strided_slice %210 {offsets = [24, 0], sizes = [8, 256], strides = [1, 1]} : vector<72x256xf32> to vector<8x256xf32>
    %c1_i32_130 = arith.constant 1 : i32
    %234 = tpu.dynamic_rotate %233 by %c1_i32_130 dim 1 : vector<8x256xf32>, i32 -> vector<8x256xf32>
    %c3_131 = arith.constant 3 : index
    %c0_132 = arith.constant 0 : index
    %c0_133 = arith.constant 0 : index
    %235 = vector.load %arg3[%c3_131, %c0_132, %c0_133] : memref<9x1x256xf32, #tpu.memory_space<vmem>>, vector<1x1x256xf32>
    %236 = vector.shape_cast %235 : vector<1x1x256xf32> to vector<1x256xf32>
    %237 = vector.broadcast %236 : vector<1x256xf32> to vector<8x256xf32>
    %238 = arith.mulf %234, %237 : vector<8x256xf32>
    %239 = arith.addf %232, %238 : vector<8x256xf32>
    %240 = vector.extract_strided_slice %210 {offsets = [32, 0], sizes = [8, 256], strides = [1, 1]} : vector<72x256xf32> to vector<8x256xf32>
    %c4_134 = arith.constant 4 : index
    %c0_135 = arith.constant 0 : index
    %c0_136 = arith.constant 0 : index
    %241 = vector.load %arg3[%c4_134, %c0_135, %c0_136] : memref<9x1x256xf32, #tpu.memory_space<vmem>>, vector<1x1x256xf32>
    %242 = vector.shape_cast %241 : vector<1x1x256xf32> to vector<1x256xf32>
    %243 = vector.broadcast %242 : vector<1x256xf32> to vector<8x256xf32>
    %244 = arith.mulf %240, %243 : vector<8x256xf32>
    %245 = arith.addf %239, %244 : vector<8x256xf32>
    %246 = vector.extract_strided_slice %210 {offsets = [40, 0], sizes = [8, 256], strides = [1, 1]} : vector<72x256xf32> to vector<8x256xf32>
    %c255_i32_137 = arith.constant 255 : i32
    %247 = tpu.dynamic_rotate %246 by %c255_i32_137 dim 1 : vector<8x256xf32>, i32 -> vector<8x256xf32>
    %c5_138 = arith.constant 5 : index
    %c0_139 = arith.constant 0 : index
    %c0_140 = arith.constant 0 : index
    %248 = vector.load %arg3[%c5_138, %c0_139, %c0_140] : memref<9x1x256xf32, #tpu.memory_space<vmem>>, vector<1x1x256xf32>
    %249 = vector.shape_cast %248 : vector<1x1x256xf32> to vector<1x256xf32>
    %250 = vector.broadcast %249 : vector<1x256xf32> to vector<8x256xf32>
    %251 = arith.mulf %247, %250 : vector<8x256xf32>
    %252 = arith.addf %245, %251 : vector<8x256xf32>
    %253 = vector.extract_strided_slice %210 {offsets = [48, 0], sizes = [8, 256], strides = [1, 1]} : vector<72x256xf32> to vector<8x256xf32>
    %c241_i32_141 = arith.constant 241 : i32
    %254 = tpu.dynamic_rotate %253 by %c241_i32_141 dim 1 : vector<8x256xf32>, i32 -> vector<8x256xf32>
    %c6_142 = arith.constant 6 : index
    %c0_143 = arith.constant 0 : index
    %c0_144 = arith.constant 0 : index
    %255 = vector.load %arg3[%c6_142, %c0_143, %c0_144] : memref<9x1x256xf32, #tpu.memory_space<vmem>>, vector<1x1x256xf32>
    %256 = vector.shape_cast %255 : vector<1x1x256xf32> to vector<1x256xf32>
    %257 = vector.broadcast %256 : vector<1x256xf32> to vector<8x256xf32>
    %258 = arith.mulf %254, %257 : vector<8x256xf32>
    %259 = arith.addf %252, %258 : vector<8x256xf32>
    %260 = vector.extract_strided_slice %210 {offsets = [56, 0], sizes = [8, 256], strides = [1, 1]} : vector<72x256xf32> to vector<8x256xf32>
    %c240_i32_145 = arith.constant 240 : i32
    %261 = tpu.dynamic_rotate %260 by %c240_i32_145 dim 1 : vector<8x256xf32>, i32 -> vector<8x256xf32>
    %c7_146 = arith.constant 7 : index
    %c0_147 = arith.constant 0 : index
    %c0_148 = arith.constant 0 : index
    %262 = vector.load %arg3[%c7_146, %c0_147, %c0_148] : memref<9x1x256xf32, #tpu.memory_space<vmem>>, vector<1x1x256xf32>
    %263 = vector.shape_cast %262 : vector<1x1x256xf32> to vector<1x256xf32>
    %264 = vector.broadcast %263 : vector<1x256xf32> to vector<8x256xf32>
    %265 = arith.mulf %261, %264 : vector<8x256xf32>
    %266 = arith.addf %259, %265 : vector<8x256xf32>
    %267 = vector.extract_strided_slice %210 {offsets = [64, 0], sizes = [8, 256], strides = [1, 1]} : vector<72x256xf32> to vector<8x256xf32>
    %c239_i32_149 = arith.constant 239 : i32
    %268 = tpu.dynamic_rotate %267 by %c239_i32_149 dim 1 : vector<8x256xf32>, i32 -> vector<8x256xf32>
    %c8_150 = arith.constant 8 : index
    %c0_151 = arith.constant 0 : index
    %c0_152 = arith.constant 0 : index
    %269 = vector.load %arg3[%c8_150, %c0_151, %c0_152] : memref<9x1x256xf32, #tpu.memory_space<vmem>>, vector<1x1x256xf32>
    %270 = vector.shape_cast %269 : vector<1x1x256xf32> to vector<1x256xf32>
    %271 = vector.broadcast %270 : vector<1x256xf32> to vector<8x256xf32>
    %272 = arith.mulf %268, %271 : vector<8x256xf32>
    %273 = arith.addf %266, %272 : vector<8x256xf32>
    %c3_153 = arith.constant 3 : index
    %c0_154 = arith.constant 0 : index
    %c0_155 = arith.constant 0 : index
    %274 = vector.load %arg4[%c3_153, %c0_154, %c0_155] : memref<4x8x256xf32, #tpu.memory_space<vmem>>, vector<1x8x256xf32>
    %275 = vector.shape_cast %274 : vector<1x8x256xf32> to vector<8x256xf32>
    %276 = vector.shape_cast %273 : vector<8x256xf32> to vector<1x8x256xf32>
    tpu.vector_store %arg4[%c3_153, %c0_154, %c0_155], %276 {strides = array<i32>} : memref<4x8x256xf32, #tpu.memory_space<vmem>>, vector<1x8x256xf32>,
    return
  }
  func.func @transform_0(%arg0: i32) -> (i32, i32, i32) {
    %c0_i32 = arith.constant 0 : i32
    %c0_i32_0 = arith.constant 0 : i32
    %c0_i32_1 = arith.constant 0 : i32
    return %arg0, %c0_i32, %c0_i32_0 : i32, i32, i32
  }
  func.func @transform_1(%arg0: i32) -> (i32, i32) {
    %c0_i32 = arith.constant 0 : i32
    %c0_i32_0 = arith.constant 0 : i32
    %c0_i32_1 = arith.constant 0 : i32
    return %c0_i32, %c0_i32_0 : i32, i32
  }
  func.func @transform_2(%arg0: i32) -> (i32, i32, i32) {
    %c0_i32 = arith.constant 0 : i32
    %c0_i32_0 = arith.constant 0 : i32
    %c0_i32_1 = arith.constant 0 : i32
    %c0_i32_2 = arith.constant 0 : i32
    return %c0_i32, %c0_i32_0, %c0_i32_1 : i32, i32, i32
  }
  func.func @transform_3(%arg0: i32) -> (i32, i32, i32) {
    %c0_i32 = arith.constant 0 : i32
    %c0_i32_0 = arith.constant 0 : i32
    %c0_i32_1 = arith.constant 0 : i32
    return %arg0, %c0_i32, %c0_i32_0 : i32, i32, i32
  }
}

</mosaic_0001>

<bundles_post_ra>
// kernel: tpu_custom_call.1
= control target key start
LH: loop header
LB: loop body
LE: loop exit
PB: predicated region body
PF: predicated region fallthrough
CT: control target
= control target key end

     0   :  { %8 = vsyncpa [#allocation3], 0  ;;  %s2719_s0 = inlined_call_operand.vmem [shape: f32[8,4,256], index: 0, kind: input, shape index: {}]   ;;  %s2720_s1 = inlined_call_operand.vmem [shape: f32[72,4], index: 1, kind: input, shape index: {}]   ;;  %s2721_s2 = inlined_call_operand.vmem [shape: f32[9,1,256], index: 2, kind: input, shape index: {}]   ;;  %s2722_s3 = inlined_call_operand.hbm [shape: f32[8,8,256], index: 3, kind: output, shape index: {}]  }
   0x1   :  { %10 = vsyncpa [#allocation3 + $0x1], 0  ;;  %s1844_s12 = smov 0   ;;  %s1846_s13 = smov 0  }
   0x2   :  { %s1848_s14 = smov 0   ;;  %s1850_s15 = smov 0  }
   0x3 LB: > { %s1865_s16 = sadd.s32 4294967295, %s1811_s15   ;;  %s1594_s17 = sadd.s32 4294967294, %s1811_s15   ;;  %s1811_s15 = sphi %s1850_s15, %s2728_s15   ;;  %s1807_s14 = sphi %s1848_s14, %s2727_s14   ;;  %s1803_s13 = sphi %s1846_s13, %s2726_s13   ;;  %s1799_s12 = sphi %s1844_s12, %s2725_s12  }
   0x4   : > { %s1869_s18 = sadd.s32 1, %s1811_s15   ;;  %s91_s19 = sadd.s32 1, %s1807_s14 }
   0x5   : > { %s88_s20 = ssub.s32 %s1811_s15, %s1869_s18  ;;  %p101_p0 = scmp.ne.s32.totalorder %s1807_s14, %s1803_s13 }
   0x6   : > { %p89_p1 = scmp.eq.s32.totalorder %s88_s20, 0  ;;  %p102_p2 = scmp.eq.s32.totalorder %s1865_s16, 1 }
   0x7   : > { %p107_p3 = scmp.ne.s32.totalorder %s1803_s13, %s1799_s12  ;;  %p108_p4 = scmp.eq.s32.totalorder %s1594_s17, 1 }
   0x8   : > { %s1880_s21 = scalar_select %p89_p1, %s1807_s14, %s91_s19  }
   0x9   : > { %p1882_p5 = por %p102_p2, %p101_p0  ;;  %p1886_p6 = por %p108_p4, %p107_p3 }
   0xa   : > { %p1597_p7 = scmp.ge.s32.totalorder %s1811_s15, 1  ;;  %p142_p8 = scmp.lt.s32.totalorder %s1811_s15, 3 }
   0xc   : > { %p143_p9 = pnand %p1597_p7, %p142_p8 }
   0xd   : > { %s1599_s24 = sshll.u32 (!%p143_p9), %s1865_s16, 2  ;;  %v1813_v0 = vmov (!%p143_p9), 0.0   ;;  %vm215_vm0 = vcmask (!%p143_p9), 1043456   ;;  %v175_v7 = vld [vmem:[%s2720_s1] sm:$0xff] (!%p143_p9)  ;;  %vm187_vm1 = vcmask (!%p143_p9), 31744   ;;  %v176_v10 = vld [vmem:[%s2720_s1 + $0x8] sm:$0xff] (!%p143_p9) }
   0xe   : > { %146 = sbr.rel (%p143_p9) target bundleno = 501 (0x1f5), region = 32  ;;  %p168_p10 = scmp.lt.s32.totalorder (!%p143_p9), %s1599_s24, 7  ;;  %284 = vmatprep.mubr.f32.mxu0 (!%p143_p9), %v1813_v0  ;;  %623 = vmatprep.mubr.f32.mxu1 (!%p143_p9), %v1813_v0  ;;  %v177_v11 = vld [vmem:[%s2720_s1 + $0x10] sm:$0xff] (!%p143_p9)  ;;  %v178_v12 = vld [vmem:[%s2720_s1 + $0x18] sm:$0xff] (!%p143_p9)  ;;  %v179_v13 = vld [vmem:[%s2720_s1 + $0x20] sm:$0xff] (!%p143_p9) }
   0xf   : > { %v180_v14 = vld [vmem:[%s2720_s1 + $0x28] sm:$0xff] (!%p143_p9)  ;;  %v181_v15 = vld [vmem:[%s2720_s1 + $0x30] sm:$0xff] (!%p143_p9)  ;;  %v182_v16 = vld [vmem:[%s2720_s1 + $0x38] sm:$0xff] (!%p143_p9)  ;;  %s1814_s29 = smov (!%p143_p9), 17   ;;  %s1815_s30 = smov (!%p143_p9), 16  }
  0x10   : > { %v183_v17 = vld [vmem:[%s2720_s1 + $0x40] sm:$0xff] (!%p143_p9)  ;;  %s1816_s4 = smov (!%p143_p9), 15   ;;  %s1817_s5 = smov (!%p143_p9), 1  }
  0x11   : > { %s1818_s6 = smov (!%p143_p9), 127   ;;  %s1819_s7 = smov (!%p143_p9), 113  }
  0x12   : > { %s1820_s8 = smov (!%p143_p9), 112   ;;  %s1821_s9 = smov (!%p143_p9), 111  }
  0x13   : > { %s164_s17 = sand.u32 (!%p143_p9), 1, %s1803_s13   ;;  %s1822_s10 = smov (!%p143_p9), [#allocation2]  }
  0x14   : > { %s1598_s19 = sshll.u32 (!%p143_p9), %s164_s17, 6  ;;  %s1753_s11 = sshll.u32 (!%p143_p9), %s1822_s10, 4  ;;  %s1754_s11 = int_to_ptr.vmem [resolvable:$false] %s1753_s11 }
  0x15   : > { %s2730_s24 = smov (!%p168_p10, %s1599_s24), 7  ;;  %s2404_s20 = scalar_lea.vmem [#allocation2], %s1598_s19 }
  0x16   : > { %s1693_s25 = sshll.u32 %s2730_s24, 3  ;;  %s1755_s19 = scalar_lea.vmem %s1754_s11, 2048 }
  0x17   : > { %s172_s28 = scalar_lea.vmem %s2719_s0, %s1693_s25 }
  0x18   : > { %v184_v1 = vld [vmem:[%s172_s28] sm:$0xff]  ;;  %v1621_v2 = vld [vmem:[%s172_s28 + $0x8] sm:$0xff]  ;;  %v1643_v3 = vld [vmem:[%s172_s28 + $0x10] sm:$0xff] }
  0x19   : > { %v186_v4 = vcombine.high %v184_v1, %v184_v1  ;;  %v554_v5 = vcombine.high %v1621_v2, %v1621_v2  ;;  %v1665_v6 = vld [vmem:[%s172_s28 + $0x18] sm:$0xff]  ;;  %v876_v8 = vcombine.high %v1643_v3, %v1643_v3 }
  0x1a   : > { %v1198_v9 = vcombine.high %v1665_v6, %v1665_v6 }
  0x1b   : > { %1602 = vmatprep.subr.msk.mxu0 %vm215_vm0, %v186_v4  ;;  %1622 = vmatprep.subr.msk.mxu1 %vm215_vm0, %v554_v5 }
  0x1c   : > { %1603 = vmatpush1.msk.msra.mxu0 %vm215_vm0, %v184_v1  ;;  %1623 = vmatpush1.msk.msra.mxu1 %vm215_vm0, %v1621_v2 }
  0x1d   : > { %1604 = vmatmul.mubr.msk.f32.vlgmr.msra.gmra.mrb[0].mxu0 %vm187_vm1, %v175_v7  ;;  %1624 = vmatmul.mubr.msk.f32.vlgmr.msra.gmra.mrb[0].mxu1 %vm187_vm1, %v175_v7 }
  0x1e   : > { %290 = vmatprep.mubr.f32.mxu0 %v1813_v0  ;;  %629 = vmatprep.mubr.f32.mxu1 %v1813_v0 }
  0x1f   : > { %1644 = vmatprep.subr.msk.mxu0 %vm215_vm0, %v876_v8  ;;  %1666 = vmatprep.subr.msk.mxu1 %vm215_vm0, %v1198_v9 }
  0x20   : > { %1645 = vmatpush1.msk.msra.mxu0 %vm215_vm0, %v1643_v3  ;;  %1667 = vmatpush1.msk.msra.mxu1 %vm215_vm0, %v1665_v6 }
  0x21   : > { %1605 = vmatmul.mubr.msk.f32.gmra.mrb[2].mxu0 %vm187_vm1, %v176_v10  ;;  %1625 = vmatmul.mubr.msk.f32.gmra.mrb[2].mxu1 %vm187_vm1, %v176_v10 }
  0x22   : > { %296 = vmatprep.mubr.f32.mxu0 %v1813_v0  ;;  %635 = vmatprep.mubr.f32.mxu1 %v1813_v0 }
  0x25   : > { %1606 = vmatmul.mubr.msk.f32.gmra.mrb[4].mxu0 %vm187_vm1, %v177_v11  ;;  %1626 = vmatmul.mubr.msk.f32.gmra.mrb[4].mxu1 %vm187_vm1, %v177_v11 }
  0x26   : > { %302 = vmatprep.mubr.f32.mxu0 %v1813_v0  ;;  %641 = vmatprep.mubr.f32.mxu1 %v1813_v0 }
  0x29   : > { %1607 = vmatmul.mubr.msk.f32.gmra.mrb[6].mxu0 %vm187_vm1, %v178_v12  ;;  %1627 = vmatmul.mubr.msk.f32.gmra.mrb[6].mxu1 %vm187_vm1, %v178_v12 }
  0x2a   : > { %308 = vmatprep.mubr.f32.mxu0 %v1813_v0  ;;  %647 = vmatprep.mubr.f32.mxu1 %v1813_v0 }
  0x2d   : > { %1608 = vmatmul.mubr.msk.f32.gmra.mrb[8].mxu0 %vm187_vm1, %v179_v13  ;;  %1628 = vmatmul.mubr.msk.f32.gmra.mrb[8].mxu1 %vm187_vm1, %v179_v13 }
  0x2e   : > { %314 = vmatprep.mubr.f32.mxu0 %v1813_v0  ;;  %653 = vmatprep.mubr.f32.mxu1 %v1813_v0 }
  0x31   : > { %1609 = vmatmul.mubr.msk.f32.gmra.mrb[10].mxu0 %vm187_vm1, %v180_v14  ;;  %1629 = vmatmul.mubr.msk.f32.gmra.mrb[10].mxu1 %vm187_vm1, %v180_v14 }
  0x32   : > { %320 = vmatprep.mubr.f32.mxu0 %v1813_v0  ;;  %659 = vmatprep.mubr.f32.mxu1 %v1813_v0 }
  0x35   : > { %1610 = vmatmul.mubr.msk.f32.gmra.mrb[12].mxu0 %vm187_vm1, %v181_v15  ;;  %1630 = vmatmul.mubr.msk.f32.gmra.mrb[12].mxu1 %vm187_vm1, %v181_v15 }
  0x36   : > { %326 = vmatprep.mubr.f32.mxu0 %v1813_v0  ;;  %665 = vmatprep.mubr.f32.mxu1 %v1813_v0 }
  0x39   : > { %1611 = vmatmul.mubr.msk.f32.gmra.mrb[14].mxu0 %vm187_vm1, %v182_v16  ;;  %1631 = vmatmul.mubr.msk.f32.gmra.mrb[14].mxu1 %vm187_vm1, %v182_v16 }
  0x3a   : > { %332 = vmatprep.mubr.f32.mxu0 %v1813_v0  ;;  %671 = vmatprep.mubr.f32.mxu1 %v1813_v0 }
  0x3d   : > { %1612 = vmatmul.mubr.msk.f32.gmra.mrb[16].mxu0 %vm187_vm1, %v183_v17  ;;  %1632 = vmatmul.mubr.msk.f32.gmra.mrb[16].mxu1 %vm187_vm1, %v183_v17 }
  0x3e   : > { %945 = vmatprep.mubr.f32.mxu0 %v1813_v0  ;;  %1267 = vmatprep.mubr.f32.mxu1 %v1813_v0 }
  0x41   : > { %1646 = vmatmul.mubr.msk.f32.vlgmr.msra.gmra.mrb[18].mxu0 %vm187_vm1, %v175_v7  ;;  %1668 = vmatmul.mubr.msk.f32.vlgmr.msra.gmra.mrb[18].mxu1 %vm187_vm1, %v175_v7 }
  0x42   : > { %951 = vmatprep.mubr.f32.mxu0 %v1813_v0  ;;  %1273 = vmatprep.mubr.f32.mxu1 %v1813_v0 }
  0x45   : > { %1647 = vmatmul.mubr.msk.f32.gmra.mrb[20].mxu0 %vm187_vm1, %v176_v10  ;;  %1669 = vmatmul.mubr.msk.f32.gmra.mrb[20].mxu1 %vm187_vm1, %v176_v10 }
  0x46   : > { %957 = vmatprep.mubr.f32.mxu0 %v1813_v0  ;;  %1279 = vmatprep.mubr.f32.mxu1 %v1813_v0 }
  0x49   : > { %1648 = vmatmul.mubr.msk.f32.gmra.mrb[22].mxu0 %vm187_vm1, %v177_v11  ;;  %1670 = vmatmul.mubr.msk.f32.gmra.mrb[22].mxu1 %vm187_vm1, %v177_v11 }
  0x4a   : > { %963 = vmatprep.mubr.f32.mxu0 %v1813_v0  ;;  %1285 = vmatprep.mubr.f32.mxu1 %v1813_v0 }
  0x4d   : > { %1649 = vmatmul.mubr.msk.f32.gmra.mrb[24].mxu0 %vm187_vm1, %v178_v12  ;;  %1671 = vmatmul.mubr.msk.f32.gmra.mrb[24].mxu1 %vm187_vm1, %v178_v12 }
  0x4e   : > { %969 = vmatprep.mubr.f32.mxu0 %v1813_v0  ;;  %1291 = vmatprep.mubr.f32.mxu1 %v1813_v0 }
  0x51   : > { %1650 = vmatmul.mubr.msk.f32.gmra.mrb[26].mxu0 %vm187_vm1, %v179_v13  ;;  %1672 = vmatmul.mubr.msk.f32.gmra.mrb[26].mxu1 %vm187_vm1, %v179_v13 }
  0x52   : > { %975 = vmatprep.mubr.f32.mxu0 %v1813_v0  ;;  %1297 = vmatprep.mubr.f32.mxu1 %v1813_v0 }
  0x55   : > { %1651 = vmatmul.mubr.msk.f32.gmra.mrb[28].mxu0 %vm187_vm1, %v180_v14  ;;  %1673 = vmatmul.mubr.msk.f32.gmra.mrb[28].mxu1 %vm187_vm1, %v180_v14 }
  0x56   : > { %981 = vmatprep.mubr.f32.mxu0 %v1813_v0  ;;  %1303 = vmatprep.mubr.f32.mxu1 %v1813_v0 }
  0x59   : > { %1652 = vmatmul.mubr.msk.f32.gmra.mrb[30].mxu0 %vm187_vm1, %v181_v15  ;;  %1674 = vmatmul.mubr.msk.f32.gmra.mrb[30].mxu1 %vm187_vm1, %v181_v15 }
  0x5a   : > { %987 = vmatprep.mubr.f32.mxu0 %v1813_v0  ;;  %1309 = vmatprep.mubr.f32.mxu1 %v1813_v0 }
  0x5d   : > { %1653 = vmatmul.mubr.msk.f32.gmra.mrb[32].mxu0 %vm187_vm1, %v182_v16  ;;  %1675 = vmatmul.mubr.msk.f32.gmra.mrb[32].mxu1 %vm187_vm1, %v182_v16 }
  0x5e   : > { %993 = vmatprep.mubr.f32.mxu0 %v1813_v0  ;;  %1315 = vmatprep.mubr.f32.mxu1 %v1813_v0 }
  0x61   : > { %1654 = vmatmul.mubr.msk.f32.gmra.mrb[34].mxu0 %vm187_vm1, %v183_v17  ;;  %1676 = vmatmul.mubr.msk.f32.gmra.mrb[34].mxu1 %vm187_vm1, %v183_v17 }
  0xf0   : > { %v286_v18 = vpop.f32.mrb[0].mxu0  ;;  %v625_v19 = vpop.f32.mrb[0].mxu1 }
  0xf1   : > { %v627_v20 = vpop.f32.mrb[1].mxu1  ;;  %339 = vrot.lane.b32.xlu0 %v286_v18, %s1814_s29  ;;  %v288_v21 = vpop.f32.mrb[1].mxu0 }
  0xf2   : > { %680 = vrot.lane.b32.xlu1 %v627_v20, %s1814_s29 }
  0xf4   : > { %v292_v22 = vpop.f32.mrb[2].mxu0  ;;  %v631_v23 = vpop.f32.mrb[2].mxu1 }
  0xf5   : > { %678 = vrot.lane.b32.xlu0 %v625_v19, %s1814_s29  ;;  %v294_v24 = vpop.f32.mrb[3].mxu0  ;;  %v633_v25 = vpop.f32.mrb[3].mxu1 }
  0xf6   : > { %364 = vrot.lane.b32.xlu1 %v292_v22, %s1815_s30 }
  0xf8   : > { %v298_v26 = vpop.f32.mrb[4].mxu0  ;;  %v637_v27 = vpop.f32.mrb[4].mxu1 }
  0xf9   : > { %341 = vrot.lane.b32.xlu0 %v288_v21, %s1814_s29  ;;  %v300_v28 = vpop.f32.mrb[5].mxu0  ;;  %v639_v29 = vpop.f32.mrb[5].mxu1 }
  0xfa   : > { %366 = vrot.lane.b32.xlu1 %v294_v24, %s1815_s30 }
  0xfc   : > { %v304_v30 = vpop.f32.mrb[6].mxu0  ;;  %v643_v31 = vpop.f32.mrb[6].mxu1 }
  0xfd   : > { %700 = vrot.lane.b32.xlu0 %v631_v23, %s1815_s30  ;;  %v306_v32 = vpop.f32.mrb[7].mxu0  ;;  %v645_v33 = vpop.f32.mrb[7].mxu1 }
  0xfe   : > { %702 = vrot.lane.b32.xlu1 %v633_v25, %s1815_s30 }
 0x100   : > { %v2011_v34 = vpop.f32.mrb[8].mxu0  ;;  %v2013_v35 = vpop.f32.mrb[8].mxu1 }
 0x101   : > { %388 = vrot.lane.b32.xlu0 %v298_v26, %s1816_s4  ;;  %v2016_v36 = vpop.f32.mrb[9].mxu0  ;;  %v2018_v37 = vpop.f32.mrb[9].mxu1 }
 0x102   : > { %390 = vrot.lane.b32.xlu1 %v300_v28, %s1816_s4 }
 0x104   : > { %v316_v38 = vpop.f32.mrb[10].mxu0  ;;  %v655_v39 = vpop.f32.mrb[10].mxu1 }
 0x105   : > { %722 = vrot.lane.b32.xlu0 %v637_v27, %s1816_s4  ;;  %v318_v40 = vpop.f32.mrb[11].mxu0  ;;  %v657_v41 = vpop.f32.mrb[11].mxu1 }
 0x106   : > { %724 = vrot.lane.b32.xlu1 %v639_v29, %s1816_s4 }
 0x108   : > { %v322_v42 = vpop.f32.mrb[12].mxu0  ;;  %v661_v43 = vpop.f32.mrb[12].mxu1 }
 0x109   : > { %412 = vrot.lane.b32.xlu0 %v304_v30, %s1817_s5  ;;  %v324_v44 = vpop.f32.mrb[13].mxu0  ;;  %v663_v45 = vpop.f32.mrb[13].mxu1 }
 0x10a   : > { %414 = vrot.lane.b32.xlu1 %v306_v32, %s1817_s5 }
 0x10c   : > { %v328_v46 = vpop.f32.mrb[14].mxu0  ;;  %v667_v47 = vpop.f32.mrb[14].mxu1 }
 0x10d   : > { %744 = vrot.lane.b32.xlu0 %v643_v31, %s1817_s5  ;;  %v330_v48 = vpop.f32.mrb[15].mxu0  ;;  %v669_v49 = vpop.f32.mrb[15].mxu1 }
 0x10e   : > { %746 = vrot.lane.b32.xlu1 %v645_v33, %s1817_s5 }
 0x110   : > { %v334_v50 = vpop.f32.mrb[16].mxu0  ;;  %v673_v51 = vpop.f32.mrb[16].mxu1 }
 0x111   : > { %453 = vrot.lane.b32.xlu0 %v316_v38, %s1818_s6  ;;  %v336_v52 = vpop.f32.mrb[17].mxu0  ;;  %v675_v53 = vpop.f32.mrb[17].mxu1  ;;  %v343_v38 = vlaneseq }
 0x112   : > { %455 = vrot.lane.b32.xlu1 %v318_v40, %s1818_s6 }
 0x114   : > { %v947_v54 = vpop.f32.mrb[18].mxu0  ;;  %v1269_v55 = vpop.f32.mrb[18].mxu1 }
 0x115   : > { %782 = vrot.lane.b32.xlu0 %v655_v39, %s1818_s6  ;;  %v949_v56 = vpop.f32.mrb[19].mxu0  ;;  %v1271_v57 = vpop.f32.mrb[19].mxu1 }
 0x116   : > { %784 = vrot.lane.b32.xlu1 %v657_v41, %s1818_s6  ;;  %v351_v41 = vshrl.u32 %v343_v38, 7 }
 0x118   : > { %v953_v58 = vpop.f32.mrb[20].mxu0  ;;  %v1275_v59 = vpop.f32.mrb[20].mxu1 }
 0x119   : > { %477 = vrot.lane.b32.xlu0 %v322_v42, %s1819_s7  ;;  %v955_v60 = vpop.f32.mrb[21].mxu0  ;;  %v1277_v61 = vpop.f32.mrb[21].mxu1 }
 0x11a   : > { %479 = vrot.lane.b32.xlu1 %v324_v44, %s1819_s7  ;;  %v2099_v44 = vsub.s32 0, %v351_v41 }
 0x11c   : > { %v959_v62 = vpop.f32.mrb[22].mxu0  ;;  %v1281_v63 = vpop.f32.mrb[22].mxu1 }
 0x11d   : > { %804 = vrot.lane.b32.xlu0 %v661_v43, %s1819_s7  ;;  %v961_v0 = vpop.f32.mrb[23].mxu0  ;;  %v1283_v1 = vpop.f32.mrb[23].mxu1 }
 0x11e   : > { %806 = vrot.lane.b32.xlu1 %v663_v45, %s1819_s7  ;;  %v2101_v45 = vsub.s32 1, %v351_v41  ;;  %v2216_v41 = vld [vmem:[%s2721_s2 + $0xa] sm:$0x3] }
 0x120   : > { %v965_v2 = vpop.f32.mrb[24].mxu0  ;;  %v1287_v3 = vpop.f32.mrb[24].mxu1 }
 0x121   : > { %501 = vrot.lane.b32.xlu0 %v328_v46, %s1820_s8  ;;  %v967_v4 = vpop.f32.mrb[25].mxu0  ;;  %v1289_v5 = vpop.f32.mrb[25].mxu1  ;;  %v1616_v46 = vld [vmem:[%s2721_s2 + $0x8] sm:$0x3] }
 0x122   : > { %503 = vrot.lane.b32.xlu1 %v330_v48, %s1820_s8  ;;  %v2109_v48 = vand.u32 127, %v343_v38 }
 0x124   : > { %v2037_v6 = vpop.f32.mrb[26].mxu0  ;;  %v2039_v7 = vpop.f32.mrb[26].mxu1  ;;  %vm345_vm2 = vcmp.lt.s32.totalorder %v2109_v48, 17  ;;  %vm368_vm3 = vcmp.lt.s32.totalorder %v2109_v48, 16  ;;  %vm392_vm4 = vcmp.lt.s32.totalorder %v2109_v48, 15  ;;  %vm416_vm5 = vcmp.lt.s32.totalorder %v2109_v48, 1 }
 0x125   : > { %826 = vrot.lane.b32.xlu0 %v667_v47, %s1820_s8  ;;  %v2042_v8 = vpop.f32.mrb[27].mxu0  ;;  %v2044_v9 = vpop.f32.mrb[27].mxu1  ;;  %v1636_v47 = vld [vmem:[%s2721_s2 + $0x8] sm:$0x3]  ;;  %vm457_vm6 = vcmp.lt.s32.totalorder %v2109_v48, 127  ;;  %vm481_vm7 = vcmp.lt.s32.totalorder %v2109_v48, 113 }
 0x126   : > { %828 = vrot.lane.b32.xlu1 %v669_v49, %s1820_s8  ;;  %vm505_vm8 = vcmp.lt.s32.totalorder %v2109_v48, 112  ;;  %vm529_vm9 = vcmp.lt.s32.totalorder %v2109_v48, 111 }
 0x128   : > { %v977_v10 = vpop.f32.mrb[28].mxu0  ;;  %v1299_v11 = vpop.f32.mrb[28].mxu1 }
 0x129   : > { %525 = vrot.lane.b32.xlu0 %v334_v50, %s1821_s9  ;;  %v979_v12 = vpop.f32.mrb[29].mxu0  ;;  %v1301_v13 = vpop.f32.mrb[29].mxu1  ;;  %v2116_v50 = vld [vmem:[%s2721_s2] sm:$0x3] }
 0x12a   : > { %527 = vrot.lane.b32.xlu1 %v336_v52, %s1821_s9  ;;  %v348_v52 = vld [vmem:[%s2721_s2] sm:$0x3] }
 0x12c   : > { %v983_v14 = vpop.f32.mrb[30].mxu0  ;;  %v1305_v15 = vpop.f32.mrb[30].mxu1 }
 0x12d   : > { %848 = vrot.lane.b32.xlu0 %v673_v51, %s1821_s9  ;;  %v985_v16 = vpop.f32.mrb[31].mxu0  ;;  %v1307_v17 = vpop.f32.mrb[31].mxu1 }
 0x12e   : > { %850 = vrot.lane.b32.xlu1 %v675_v53, %s1821_s9  ;;  %v1613_v53 = vld [vmem:[%s2721_s2 + $0x2] sm:$0x3] }
 0x130   : > { %v989_v18 = vpop.f32.mrb[32].mxu0  ;;  %v1311_v19 = vpop.f32.mrb[32].mxu1 }
 0x131   : > { %1002 = vrot.lane.b32.xlu0 %v949_v56, %s1814_s29  ;;  %v991_v20 = vpop.f32.mrb[33].mxu0  ;;  %v1313_v21 = vpop.f32.mrb[33].mxu1  ;;  %v771_v56 = vrot.slane %v1636_v47, %v2099_v44 }
 0x132   : > { %1000 = vrot.lane.b32.xlu1 %v947_v54, %s1814_s29  ;;  %v442_v54 = vrot.slane %v1616_v46, %v2099_v44 }
 0x133   : > { %v2204_v38 = vmul.f32 %v771_v56, %v2013_v35  ;;  %v2225_v35 = vld [vmem:[%s2721_s2 + $0xc] sm:$0x3] }
 0x134   : > { %v995_v22 = vpop.f32.mrb[34].mxu0  ;;  %v1317_v23 = vpop.f32.mrb[34].mxu1 }
 0x135   : > { %1324 = vrot.lane.b32.xlu0 %v1271_v57, %s1814_s29  ;;  %v997_v24 = vpop.f32.mrb[35].mxu0  ;;  %v1319_v25 = vpop.f32.mrb[35].mxu1  ;;  %v2132_v57 = vld [vmem:[%s2721_s2 + $0x2] sm:$0x3] }
 0x136   : > { %1322 = vrot.lane.b32.xlu1 %v1269_v55, %s1814_s29  ;;  %v446_v55 = vrot.slane %v1616_v46, %v2101_v45 }
 0x139   : > { %1024 = vrot.lane.b32.xlu0 %v955_v60, %s1815_s30  ;;  %v693_v60 = vrot.slane %v2116_v50, %v2101_v45 }
 0x13a   : > { %1022 = vrot.lane.b32.xlu1 %v953_v58, %s1815_s30  ;;  %v775_v58 = vrot.slane %v1636_v47, %v2101_v45 }
 0x13d   : > { %1346 = vrot.lane.b32.xlu0 %v1277_v61, %s1815_s30  ;;  %v1614_v61 = vld [vmem:[%s2721_s2 + $0x4] sm:$0x3] }
 0x13e   : > { %1344 = vrot.lane.b32.xlu1 %v1275_v59, %s1815_s30  ;;  %v689_v59 = vrot.slane %v2116_v50, %v2099_v44  ;;  %v2313_v50 = vld [vmem:[%s2721_s2 + $0xe] sm:$0x3] }
 0x141   : > { %1046 = vrot.lane.b32.xlu0 %v961_v0, %s1816_s4  ;;  %v353_v0 = vrot.slane %v348_v52, %v2099_v44 }
 0x142   : > { %1044 = vrot.lane.b32.xlu1 %v959_v62, %s1816_s4  ;;  %v2146_v62 = vld [vmem:[%s2721_s2 + $0x4] sm:$0x3] }
 0x145   : > { %1368 = vrot.lane.b32.xlu0 %v1283_v1, %s1816_s4  ;;  %v357_v1 = vrot.slane %v348_v52, %v2101_v45 }
 0x146   : > { %1366 = vrot.lane.b32.xlu1 %v1281_v63, %s1816_s4  ;;  %s1695_s4 = sshll.u32 %s1865_s16, 10  ;;  %s2677_s16 = scalar_lea.sflag [#allocation3], %s164_s17 }
 0x149   : > { %1068 = vrot.lane.b32.xlu0 %v967_v4, %s1817_s5 }
 0x14a   : > { %1066 = vrot.lane.b32.xlu1 %v965_v2, %s1817_s5  ;;  %v377_v2 = vrot.slane %v1613_v53, %v2099_v44 }
 0x14d   : > { %1390 = vrot.lane.b32.xlu0 %v1289_v5, %s1817_s5  ;;  %v381_v5 = vrot.slane %v1613_v53, %v2101_v45 }
 0x14e   : > { %1388 = vrot.lane.b32.xlu1 %v1287_v3, %s1817_s5  ;;  %v2157_v3 = vld [vmem:[%s2721_s2 + $0x6] sm:$0x3]  ;;  %s1532_s5 = sshll.u32 %s2404_s20, 4  ;;  %s2671_s5 = int_to_ptr.vmem [resolvable:$true] %s1532_s5 }
 0x14f   : > { %p1756_p0 = scmp.lt.s32.totalorder %s2671_s5, %s1754_s11 }
 0x151   : > { %1104 = vrot.lane.b32.xlu0 %v977_v10, %s1818_s6  ;;  %v711_v10 = vrot.slane %v2132_v57, %v2099_v44 }
 0x152   : > { %1106 = vrot.lane.b32.xlu1 %v979_v12, %s1818_s6  ;;  %v2170_v12 = vld [vmem:[%s2721_s2 + $0x6] sm:$0x3] }
 0x155   : > { %1426 = vrot.lane.b32.xlu0 %v1299_v11, %s1818_s6  ;;  %v715_v11 = vrot.slane %v2132_v57, %v2101_v45  ;;  %v793_v57 = vrot.slane %v2216_v41, %v2099_v44 }
 0x156   : > { %1428 = vrot.lane.b32.xlu1 %v1301_v13, %s1818_s6  ;;  %v401_v13 = vrot.slane %v1614_v61, %v2099_v44 }
 0x159   : > { %1126 = vrot.lane.b32.xlu0 %v983_v14, %s1819_s7  ;;  %v405_v14 = vrot.slane %v1614_v61, %v2101_v45 }
 0x15a   : > { %1128 = vrot.lane.b32.xlu1 %v985_v16, %s1819_s7  ;;  %v737_v16 = vrot.slane %v2146_v62, %v2101_v45 }
 0x15d   : > { %1448 = vrot.lane.b32.xlu0 %v1305_v15, %s1819_s7  ;;  %v733_v15 = vrot.slane %v2146_v62, %v2099_v44  ;;  %v490_v62 = vrot.slane %v2225_v35, %v2099_v44 }
 0x15e   : > { %1450 = vrot.lane.b32.xlu1 %v1307_v17, %s1819_s7 }
 0x161   : > { %1148 = vrot.lane.b32.xlu0 %v989_v18, %s1820_s8 }
 0x162   : > { %1150 = vrot.lane.b32.xlu1 %v991_v20, %s1820_s8 }
 0x163   : > { %v340_v26 = vpop.permute.xlu0 %339 }
 0x164   : > { %v2077_v27 = vpop.permute.xlu1 %680 }
 0x165   : > { %1470 = vrot.lane.b32.xlu0 %v1311_v19, %s1820_s8  ;;  %v425_v19 = vrot.slane %v2157_v3, %v2099_v44 }
 0x166   : > { %1472 = vrot.lane.b32.xlu1 %v1313_v21, %s1820_s8  ;;  %s2669_s8 = scalar_lea.hbm %s2722_s3, %s1695_s4 }
 0x167   : > { %v2081_v28 = vpop.permute.xlu0 %678 }
 0x168   : > { %v365_v29 = vpop.permute.xlu1 %364 }
 0x169   : > { %1170 = vrot.lane.b32.xlu0 %v995_v22, %s1821_s9 }
 0x16a   : > { %1172 = vrot.lane.b32.xlu1 %v997_v24, %s1821_s9  ;;  %v755_v24 = vrot.slane %v2170_v12, %v2099_v44 }
 0x16b   : > { %v342_v30 = vpop.permute.xlu0 %341 }
 0x16c   : > { %v367_v31 = vpop.permute.xlu1 %366  ;;  %v346_v17 = vsel %vm345_vm2, %v340_v26, %v342_v30  ;;  %v347_v18 = vsel %vm345_vm2, %v342_v30, %v340_v26  ;;  %v2198_v26 = vmul.f32 %v442_v54, %v2011_v34  ;;  %v2201_v30 = vmul.f32 %v446_v55, %v2016_v36 }
 0x16d   : > { %1492 = vrot.lane.b32.xlu0 %v1317_v23, %s1821_s9  ;;  %v369_v21 = vsel %vm368_vm3, %v365_v29, %v367_v31  ;;  %v370_v22 = vsel %vm368_vm3, %v367_v31, %v365_v29  ;;  %v429_v23 = vrot.slane %v2157_v3, %v2101_v45  ;;  %v759_v29 = vrot.slane %v2170_v12, %v2101_v45  ;;  %v2211_v31 = vld [vmem:[%s2721_s2 + $0xa] sm:$0x3] }
 0x16e   : > { %1494 = vrot.lane.b32.xlu1 %v1319_v25, %s1821_s9  ;;  %v2219_v34 = vmul.f32 %v775_v58, %v2018_v37  ;;  %v360_v36 = vmul.f32 %v353_v0, %v347_v18  ;;  %v361_v46 = vmul.f32 %v357_v1, %v346_v17  ;;  %v384_v47 = vmul.f32 %v377_v2, %v370_v22  ;;  %s1749_s9 = scalar_lea.vmem %s2671_s5, 1024 }
 0x16f   : > { %v2087_v32 = vpop.permute.xlu0 %700  ;;  %v385_v52 = vmul.f32 %v381_v5, %v369_v21  ;;  %v466_v55 = vrot.slane %v2211_v31, %v2099_v44  ;;  %v470_v56 = vrot.slane %v2211_v31, %v2101_v45  ;;  %v797_v58 = vrot.slane %v2216_v41, %v2101_v45  ;;  %p1750_p11 = scmp.ne.s32.totalorder %s2671_s5, %s1749_s9  ;;  %p1757_p1 = scmp.lt.s32.totalorder %s1755_s19, %s1749_s9 }
 0x170   : > { %v2089_v33 = vpop.permute.xlu1 %702  ;;  %v494_v0 = vrot.slane %v2225_v35, %v2101_v45  ;;  %v682_v5 = vsel %vm345_vm2, %v2081_v28, %v2077_v27 }
 0x171   : > { %v387_v17 = vadd.f32 %v385_v52, %v361_v46  ;;  %p1751_p12 = pnand %p1750_p11, %p1882_p5  ;;  %p1758_p2 = por %p1757_p1, %p1756_p0 }
 0x173   : > { %v2091_v39 = vpop.permute.xlu0 %388  ;;  %p1752_p13 = pneg %p1751_p12 }
 0x174   : > { %v2093_v40 = vpop.permute.xlu1 %390 }
 0x175   : > { %v393_v53 = vsel %vm392_vm4, %v2091_v39, %v2093_v40  ;;  %v394_v37 = vsel %vm392_vm4, %v2093_v40, %v2091_v39  ;;  %v704_v39 = vsel %vm368_vm3, %v2087_v32, %v2089_v33  ;;  %v705_v40 = vsel %vm368_vm3, %v2089_v33, %v2087_v32  ;;  %v2271_v33 = vld [vmem:[%s2721_s2 + $0xc] sm:$0x3]  ;;  %p1759_p3 = pnand %p1758_p2, %p1752_p13 }
 0x176   : > { %v408_v1 = vmul.f32 %v401_v13, %v394_v37  ;;  %v409_v2 = vmul.f32 %v405_v14, %v393_v53  ;;  %v683_v13 = vsel %vm345_vm2, %v2077_v27, %v2081_v28  ;;  %v386_v14 = vadd.f32 %v384_v47, %v360_v36 }
 0x177   : > { %v2095_v42 = vpop.permute.xlu0 %722  ;;  %v718_v21 = vmul.f32 %v711_v10, %v705_v40  ;;  %v815_v27 = vrot.slane %v2271_v33, %v2099_v44  ;;  %v819_v28 = vrot.slane %v2271_v33, %v2101_v45  ;;  %v1619_v10 = vld [vmem:[%s2721_s2 + $0xe] sm:$0x3] }
 0x178   : > { %v2097_v43 = vpop.permute.xlu1 %724 }
 0x179   : > { %v727_v22 = vsel %vm392_vm4, %v2097_v43, %v2095_v42 }
 0x17b   : > { %v2111_v49 = vpop.permute.xlu0 %412 }
 0x17c   : > { %v2118_v51 = vpop.permute.xlu1 %414 }
 0x17d   : > { %v417_v3 = vsel %vm416_vm5, %v2111_v49, %v2118_v51  ;;  %v418_v32 = vsel %vm416_vm5, %v2118_v51, %v2111_v49  ;;  %v719_v49 = vmul.f32 %v715_v11, %v704_v39  ;;  %v726_v51 = vsel %vm392_vm4, %v2095_v42, %v2097_v43 }
 0x17e   : > { %v432_v53 = vmul.f32 %v425_v19, %v418_v32  ;;  %v433_v37 = vmul.f32 %v429_v23, %v417_v3  ;;  %v696_v11 = vmul.f32 %v689_v59, %v683_v13  ;;  %v697_v42 = vmul.f32 %v693_v60, %v682_v5 }
 0x17f   : > { %v2148_v63 = vpop.permute.xlu0 %744  ;;  %v410_v43 = vadd.f32 %v408_v1, %v386_v14  ;;  %v411_v19 = vadd.f32 %v409_v2, %v387_v17  ;;  %v740_v23 = vmul.f32 %v733_v15, %v727_v22  ;;  %v741_v36 = vmul.f32 %v737_v16, %v726_v51 }
 0x180   : > { %v2159_v4 = vpop.permute.xlu1 %746  ;;  %v720_v59 = vadd.f32 %v718_v21, %v696_v11  ;;  %v721_v60 = vadd.f32 %v719_v49, %v697_v42  ;;  %v514_v16 = vrot.slane %v1619_v10, %v2099_v44  ;;  %v518_v3 = vrot.slane %v1619_v10, %v2101_v45  ;;  %v1620_v21 = vld [vmem:[%s2721_s2 + $0x10] sm:$0x3] }
 0x181   : > { %v748_v46 = vsel %vm416_vm5, %v2148_v63, %v2159_v4  ;;  %v749_v47 = vsel %vm416_vm5, %v2159_v4, %v2148_v63  ;;  %v434_v39 = vadd.f32 %v432_v53, %v410_v43  ;;  %v435_v40 = vadd.f32 %v433_v37, %v411_v19  ;;  %v1640_v10 = vld [vmem:[%s2721_s2 + $0x10] sm:$0x3] }
 0x182   : > { %v762_v1 = vmul.f32 %v755_v24, %v749_v47  ;;  %v763_v2 = vmul.f32 %v759_v29, %v748_v46  ;;  %v837_v32 = vrot.slane %v2313_v50, %v2099_v44  ;;  %v742_v5 = vadd.f32 %v740_v23, %v720_v59 }
 0x183   : > { %v2185_v20 = vpop.permute.xlu0 %453  ;;  %v743_v13 = vadd.f32 %v741_v36, %v721_v60  ;;  %v841_v17 = vrot.slane %v2313_v50, %v2101_v45  ;;  %v451_v49 = vadd.f32 %v2198_v26, %v434_v39  ;;  %v452_v51 = vadd.f32 %v2201_v30, %v435_v40 }
 0x184   : > { %v2195_v25 = vpop.permute.xlu1 %455  ;;  %v863_v41 = vrot.slane %v1640_v10, %v2101_v45 }
 0x185   : > { %v458_v63 = vsel %vm457_vm6, %v2185_v20, %v2195_v25  ;;  %v459_v4 = vsel %vm457_vm6, %v2195_v25, %v2185_v20  ;;  %v765_v22 = vadd.f32 %v763_v2, %v743_v13 }
 0x186   : > { %v473_v20 = vmul.f32 %v466_v55, %v458_v63  ;;  %v474_v25 = vmul.f32 %v470_v56, %v459_v4 }
 0x187   : > { %v2235_v54 = vpop.permute.xlu0 %782  ;;  %v781_v47 = vadd.f32 %v2219_v34, %v765_v22 }
 0x188   : > { %v2245_v61 = vpop.permute.xlu1 %784  ;;  %v475_v11 = vadd.f32 %v473_v20, %v451_v49  ;;  %v476_v42 = vadd.f32 %v474_v25, %v452_v51 }
 0x189   : > { %v786_v55 = vsel %vm457_vm6, %v2235_v54, %v2245_v61  ;;  %v787_v56 = vsel %vm457_vm6, %v2245_v61, %v2235_v54  ;;  %v538_v54 = vrot.slane %v1620_v21, %v2099_v44  ;;  %v542_v61 = vrot.slane %v1620_v21, %v2101_v45 }
 0x18a   : > { %v800_v43 = vmul.f32 %v793_v57, %v786_v55  ;;  %v801_v35 = vmul.f32 %v797_v58, %v787_v56  ;;  %v859_v57 = vrot.slane %v1640_v10, %v2099_v44 }
 0x18b   : > { %v478_v18 = vpop.permute.xlu0 %477 }
 0x18c   : > { %v480_v31 = vpop.permute.xlu1 %479 }
 0x18d   : > { %v482_v24 = vsel %vm481_vm7, %v478_v18, %v480_v31  ;;  %v483_v12 = vsel %vm481_vm7, %v480_v31, %v478_v18  ;;  %v764_v18 = vadd.f32 %v762_v1, %v742_v5 }
 0x18e   : > { %v497_v30 = vmul.f32 %v490_v62, %v482_v24  ;;  %v498_v53 = vmul.f32 %v494_v0, %v483_v12 }
 0x18f   : > { %v805_v52 = vpop.permute.xlu0 %804  ;;  %v780_v46 = vadd.f32 %v2204_v38, %v764_v18 }
 0x190   : > { %v807_v15 = vpop.permute.xlu1 %806  ;;  %v499_v58 = vadd.f32 %v497_v30, %v475_v11  ;;  %v500_v50 = vadd.f32 %v498_v53, %v476_v42  ;;  %v1658_v11 = vld [vmem:[%s2721_s2 + $0x8] sm:$0x3] }
 0x191   : > { %v808_v0 = vsel %vm481_vm7, %v805_v52, %v807_v15  ;;  %v809_v19 = vsel %vm481_vm7, %v807_v15, %v805_v52  ;;  %v802_v15 = vadd.f32 %v800_v43, %v780_v46  ;;  %v1680_v42 = vld [vmem:[%s2721_s2 + $0x8] sm:$0x3]  ;;  %v2438_v46 = vld [vmem:[%s2721_s2] sm:$0x3] }
 0x192   : > { %v822_v38 = vmul.f32 %v815_v27, %v808_v0  ;;  %v823_v34 = vmul.f32 %v819_v28, %v809_v19  ;;  %v1415_v0 = vrot.slane %v1680_v42, %v2099_v44  ;;  %v1097_v19 = vrot.slane %v1658_v11, %v2101_v45 }
 0x193   : > { %v502_v14 = vpop.permute.xlu0 %501 }
 0x194   : > { %v504_v29 = vpop.permute.xlu1 %503 }
 0x195   : > { %v506_v31 = vsel %vm505_vm8, %v502_v14, %v504_v29  ;;  %v507_v26 = vsel %vm505_vm8, %v504_v29, %v502_v14  ;;  %v824_v14 = vadd.f32 %v822_v38, %v802_v15  ;;  %v1656_v15 = vld [vmem:[%s2721_s2 + $0x4] sm:$0x3] }
 0x196   : > { %v521_v23 = vmul.f32 %v514_v16, %v506_v31  ;;  %v522_v36 = vmul.f32 %v518_v3, %v507_v26  ;;  %v803_v16 = vadd.f32 %v801_v35, %v781_v47 }
 0x197   : > { %v827_v37 = vpop.permute.xlu0 %826 }
 0x198   : > { %v829_v62 = vpop.permute.xlu1 %828  ;;  %v523_v40 = vadd.f32 %v521_v23, %v499_v58  ;;  %v524_v63 = vadd.f32 %v522_v36, %v500_v50  ;;  %v825_v20 = vadd.f32 %v823_v34, %v803_v16  ;;  %v1419_v23 = vrot.slane %v1680_v42, %v2101_v45  ;;  %v1006_v36 = vld [vmem:[%s2721_s2] sm:$0x3]  ;;  %v2474_v34 = vld [vmem:[%s2721_s2 + $0x4] sm:$0x3] }
 0x199   : > { %v830_v59 = vsel %vm505_vm8, %v827_v37, %v829_v62  ;;  %v831_v52 = vsel %vm505_vm8, %v829_v62, %v827_v37  ;;  %v1093_v62 = vrot.slane %v1658_v11, %v2099_v44  ;;  %v2462_v16 = vmul.f32 %v1097_v19, %v2042_v8 }
 0x19a   : > { %v844_v2 = vmul.f32 %v837_v32, %v830_v59  ;;  %v845_v3 = vmul.f32 %v841_v17, %v831_v52  ;;  %v2454_v59 = vmul.f32 %v1415_v0, %v2039_v7  ;;  %v1011_v52 = vrot.slane %v1006_v36, %v2099_v44 }
 0x19b   : > { %v526_v60 = vpop.permute.xlu0 %525  ;;  %v2451_v50 = vmul.f32 %v1093_v62, %v2037_v6  ;;  %v2465_v38 = vmul.f32 %v1419_v23, %v2044_v9  ;;  %v1333_v6 = vrot.slane %v2438_v46, %v2099_v44  ;;  %v1337_v7 = vrot.slane %v2438_v46, %v2101_v45 }
 0x19c   : > { %v528_v39 = vpop.permute.xlu1 %527  ;;  %v846_v29 = vadd.f32 %v844_v2, %v824_v14  ;;  %v847_v21 = vadd.f32 %v845_v3, %v825_v20  ;;  %v1377_v14 = vrot.slane %v2474_v34, %v2099_v44  ;;  %v1381_v20 = vrot.slane %v2474_v34, %v2101_v45 }
 0x19d   : > { %v530_v4 = vsel %vm529_vm9, %v526_v60, %v528_v39  ;;  %v531_v1 = vsel %vm529_vm9, %v528_v39, %v526_v60  ;;  %v1015_v60 = vrot.slane %v1006_v36, %v2101_v45  ;;  %v1657_v39 = vld [vmem:[%s2721_s2 + $0x6] sm:$0x3] }
 0x19e   : > { %v545_v5 = vmul.f32 %v538_v54, %v530_v4  ;;  %v546_v13 = vmul.f32 %v542_v61, %v531_v1  ;;  %v2486_v4 = vld [vmem:[%s2721_s2 + $0x6] sm:$0x3] }
 0x19f   : > { %v849_v27 = vpop.permute.xlu0 %848 }
 0x1a0   : > { %v547_v33 = vadd.f32 %v545_v5, %v523_v40  ;;  %v548_v28 = vadd.f32 %v546_v13, %v524_v63  ;;  %v851_v25 = vpop.permute.xlu1 %850  ;;  %v1055_v5 = vrot.slane %v1656_v15, %v2099_v44  ;;  %v1059_v13 = vrot.slane %v1656_v15, %v2101_v45 }
 0x1a1   : > { %v852_v24 = vsel %vm529_vm9, %v849_v27, %v851_v25  ;;  %v853_v12 = vsel %vm529_vm9, %v851_v25, %v849_v27  ;;  %v2507_v25 = vld [vmem:[%s2721_s2 + $0xa] sm:$0x3] }
 0x1a2   : > { %549 = vst [vmem:[%s2404_s20] sm:$0xff] %v547_v33  ;;  %550 = vst [vmem:[%s2404_s20 + $0x8] sm:$0xff] %v548_v28  ;;  %v866_v32 = vmul.f32 %v859_v57, %v852_v24  ;;  %v867_v17 = vmul.f32 %v863_v41, %v853_v12  ;;  %v1655_v57 = vld [vmem:[%s2721_s2 + $0x2] sm:$0x3]  ;;  %v1077_v33 = vrot.slane %v1657_v39, %v2099_v44  ;;  %v2512_v24 = vld [vmem:[%s2721_s2 + $0xa] sm:$0x3] }
 0x1a3   : > { %v1003_v49 = vpop.permute.xlu0 %1002  ;;  %v1677_v41 = vld [vmem:[%s2721_s2 + $0x2] sm:$0x3]  ;;  %v1033_v8 = vrot.slane %v1655_v57, %v2099_v44  ;;  %v1037_v9 = vrot.slane %v1655_v57, %v2101_v45  ;;  %v1081_v28 = vrot.slane %v1657_v39, %v2101_v45  ;;  %v1115_v11 = vrot.slane %v2507_v25, %v2099_v44 }
 0x1a4   : > { %v868_v51 = vadd.f32 %v866_v32, %v846_v29  ;;  %v869_v55 = vadd.f32 %v867_v17, %v847_v21  ;;  %v1001_v56 = vpop.permute.xlu1 %1000  ;;  %v1355_v40 = vrot.slane %v1677_v41, %v2099_v44  ;;  %v1359_v63 = vrot.slane %v1677_v41, %v2101_v45  ;;  %v1660_v41 = vld [vmem:[%s2721_s2 + $0xc] sm:$0x3] }
 0x1a5   : > { %v1004_v12 = vsel %vm345_vm2, %v1001_v56, %v1003_v49  ;;  %v1005_v29 = vsel %vm345_vm2, %v1003_v49, %v1001_v56  ;;  %v1399_v21 = vrot.slane %v2486_v4, %v2099_v44  ;;  %v1403_v32 = vrot.slane %v2486_v4, %v2101_v45 }
 0x1a6   : > { %1641 = vst [vmem:[%s2404_s20 + $0x10] sm:$0xff] %v868_v51  ;;  %1642 = vst [vmem:[%s2404_s20 + $0x18] sm:$0xff] %v869_v55  ;;  %v1119_v49 = vrot.slane %v2507_v25, %v2101_v45  ;;  %v1437_v56 = vrot.slane %v2512_v24, %v2099_v44  ;;  %v1441_v42 = vrot.slane %v2512_v24, %v2101_v45 }
 0x1a7   : > { %v2410_v18 = vpop.permute.xlu0 %1324  ;;  %v1018_v0 = vmul.f32 %v1011_v52, %v1005_v29  ;;  %v1019_v19 = vmul.f32 %v1015_v60, %v1004_v12  ;;  %v2594_v29 = vld [vmem:[%s2721_s2 + $0xe] sm:$0x3] }
 0x1a8   : > { %v2412_v22 = vpop.permute.xlu1 %1322 }
 0x1a9   : > { %v1326_v52 = vsel %vm345_vm2, %v2412_v22, %v2410_v18 }
 0x1ab   : > { %v1025_v31 = vpop.permute.xlu0 %1024 }
 0x1ac   : > { %v1023_v26 = vpop.permute.xlu1 %1022 }
 0x1ad   : > { %v1026_v2 = vsel %vm368_vm3, %v1023_v26, %v1025_v31  ;;  %v1027_v3 = vsel %vm368_vm3, %v1025_v31, %v1023_v26 }
 0x1ae   : > { %v1040_v17 = vmul.f32 %v1033_v8, %v1027_v3  ;;  %v1041_v51 = vmul.f32 %v1037_v9, %v1026_v2  ;;  %v1341_v2 = vmul.f32 %v1337_v7, %v1326_v52 }
 0x1af   : > { %v2414_v30 = vpop.permute.xlu0 %1346 }
 0x1b0   : > { %v2416_v53 = vpop.permute.xlu1 %1344  ;;  %v1043_v60 = vadd.f32 %v1041_v51, %v1019_v19 }
 0x1b3   : > { %v1047_v37 = vpop.permute.xlu0 %1046 }
 0x1b4   : > { %v1045_v54 = vpop.permute.xlu1 %1044 }
 0x1b5   : > { %v1048_v55 = vsel %vm392_vm4, %v1045_v54, %v1047_v37  ;;  %v1049_v31 = vsel %vm392_vm4, %v1047_v37, %v1045_v54  ;;  %v1348_v37 = vsel %vm368_vm3, %v2416_v53, %v2414_v30  ;;  %v1349_v54 = vsel %vm368_vm3, %v2414_v30, %v2416_v53 }
 0x1b6   : > { %v1062_v23 = vmul.f32 %v1055_v5, %v1049_v31  ;;  %v1063_v36 = vmul.f32 %v1059_v13, %v1048_v55  ;;  %v1327_v30 = vsel %vm345_vm2, %v2410_v18, %v2412_v22  ;;  %v1042_v53 = vadd.f32 %v1040_v17, %v1018_v0 }
 0x1b7   : > { %v2418_v61 = vpop.permute.xlu0 %1368  ;;  %v1362_v34 = vmul.f32 %v1355_v40, %v1349_v54  ;;  %v1363_v39 = vmul.f32 %v1359_v63, %v1348_v37  ;;  %v1137_v18 = vrot.slane %v1660_v41, %v2099_v44  ;;  %v1141_v22 = vrot.slane %v1660_v41, %v2101_v45  ;;  %v2574_v40 = vld [vmem:[%s2721_s2 + $0xc] sm:$0x3] }
 0x1b8   : > { %v2420_v10 = vpop.permute.xlu1 %1366  ;;  %v1340_v63 = vmul.f32 %v1333_v6, %v1327_v30  ;;  %v1064_v3 = vadd.f32 %v1062_v23, %v1042_v53  ;;  %v1065_v5 = vadd.f32 %v1063_v36, %v1043_v60  ;;  %v1661_v6 = vld [vmem:[%s2721_s2 + $0xe] sm:$0x3]  ;;  %v1481_v36 = vrot.slane %v2594_v29, %v2099_v44 }
 0x1b9   : > { %v1159_v0 = vrot.slane %v1661_v6, %v2099_v44  ;;  %v1163_v19 = vrot.slane %v1661_v6, %v2101_v45 }
 0x1ba   : > { %v1364_v7 = vadd.f32 %v1362_v34, %v1340_v63 }
 0x1bb   : > { %v1069_v43 = vpop.permute.xlu0 %1068 }
 0x1bc   : > { %v1067_v35 = vpop.permute.xlu1 %1066 }
 0x1bd   : > { %v1070_v46 = vsel %vm416_vm5, %v1067_v35, %v1069_v43  ;;  %v1071_v57 = vsel %vm416_vm5, %v1069_v43, %v1067_v35  ;;  %v1370_v43 = vsel %vm392_vm4, %v2420_v10, %v2418_v61  ;;  %v1371_v35 = vsel %vm392_vm4, %v2418_v61, %v2420_v10 }
 0x1be   : > { %v1084_v9 = vmul.f32 %v1077_v33, %v1071_v57  ;;  %v1085_v4 = vmul.f32 %v1081_v28, %v1070_v46  ;;  %v1384_v13 = vmul.f32 %v1377_v14, %v1371_v35  ;;  %v1385_v25 = vmul.f32 %v1381_v20, %v1370_v43 }
 0x1bf   : > { %v2440_v47 = vpop.permute.xlu0 %1390  ;;  %v1365_v28 = vadd.f32 %v1363_v39, %v1341_v2  ;;  %v1459_v14 = vrot.slane %v2574_v40, %v2099_v44  ;;  %v1463_v20 = vrot.slane %v2574_v40, %v2101_v45  ;;  %v1485_v46 = vrot.slane %v2594_v29, %v2101_v45 }
 0x1c0   : > { %v2448_v58 = vpop.permute.xlu1 %1388  ;;  %v1386_v37 = vadd.f32 %v1384_v13, %v1364_v7 }
 0x1c1   : > { %v1392_v61 = vsel %vm416_vm5, %v2448_v58, %v2440_v47  ;;  %v1393_v10 = vsel %vm416_vm5, %v2440_v47, %v2448_v58  ;;  %v1086_v47 = vadd.f32 %v1084_v9, %v1064_v3  ;;  %v1087_v58 = vadd.f32 %v1085_v4, %v1065_v5 }
 0x1c2   : > { %v1406_v55 = vmul.f32 %v1399_v21, %v1393_v10  ;;  %v1407_v31 = vmul.f32 %v1403_v32, %v1392_v61  ;;  %v1387_v54 = vadd.f32 %v1385_v25, %v1365_v28  ;;  %v1662_v32 = vld [vmem:[%s2721_s2 + $0x10] sm:$0x3] }
 0x1c3   : > { %v2488_v1 = vpop.permute.xlu0 %1104  ;;  %v1102_v52 = vadd.f32 %v2451_v50, %v1086_v47  ;;  %v1103_v30 = vadd.f32 %v2462_v16, %v1087_v58  ;;  %v1181_v43 = vrot.slane %v1662_v32, %v2099_v44  ;;  %v1185_v35 = vrot.slane %v1662_v32, %v2101_v45 }
 0x1c4   : > { %v2496_v27 = vpop.permute.xlu1 %1106  ;;  %v1408_v53 = vadd.f32 %v1406_v55, %v1386_v37  ;;  %v1409_v60 = vadd.f32 %v1407_v31, %v1387_v54 }
 0x1c5   : > { %v1108_v17 = vsel %vm457_vm6, %v2488_v1, %v2496_v27  ;;  %v1109_v51 = vsel %vm457_vm6, %v2496_v27, %v2488_v1 }
 0x1c6   : > { %v1122_v57 = vmul.f32 %v1115_v11, %v1108_v17  ;;  %v1123_v41 = vmul.f32 %v1119_v49, %v1109_v51  ;;  %v1424_v3 = vadd.f32 %v2454_v59, %v1408_v53  ;;  %v1425_v5 = vadd.f32 %v2465_v38, %v1409_v60 }
 0x1c7   : > { %v2526_v26 = vpop.permute.xlu0 %1426 }
 0x1c8   : > { %v2536_v62 = vpop.permute.xlu1 %1428 }
 0x1c9   : > { %v1430_v11 = vsel %vm457_vm6, %v2526_v26, %v2536_v62  ;;  %v1431_v49 = vsel %vm457_vm6, %v2536_v62, %v2526_v26  ;;  %v1124_v26 = vadd.f32 %v1122_v57, %v1102_v52  ;;  %v1125_v62 = vadd.f32 %v1123_v41, %v1103_v30 }
 0x1ca   : > { %v1444_v9 = vmul.f32 %v1437_v56, %v1430_v11  ;;  %v1445_v4 = vmul.f32 %v1441_v42, %v1431_v49 }
 0x1cb   : > { %v1127_v15 = vpop.permute.xlu0 %1126 }
 0x1cc   : > { %v1129_v8 = vpop.permute.xlu1 %1128  ;;  %v1447_v6 = vadd.f32 %v1445_v4, %v1425_v5 }
 0x1cd   : > { %v1130_v1 = vsel %vm481_vm7, %v1127_v15, %v1129_v8  ;;  %v1131_v27 = vsel %vm481_vm7, %v1129_v8, %v1127_v15  ;;  %v1684_v8 = vld [vmem:[%s2721_s2 + $0x10] sm:$0x3] }
 0x1ce   : > { %v1144_v34 = vmul.f32 %v1137_v18, %v1130_v1  ;;  %v1145_v16 = vmul.f32 %v1141_v22, %v1131_v27  ;;  %v1503_v13 = vrot.slane %v1684_v8, %v2099_v44  ;;  %v1507_v56 = vrot.slane %v1684_v8, %v2101_v45 }
 0x1cf   : > { %v1449_v33 = vpop.permute.xlu0 %1448 }
 0x1d0   : > { %v1451_v12 = vpop.permute.xlu1 %1450  ;;  %v1146_v25 = vadd.f32 %v1144_v34, %v1124_v26  ;;  %v1147_v24 = vadd.f32 %v1145_v16, %v1125_v62 }
 0x1d1   : > { %v1452_v22 = vsel %vm481_vm7, %v1449_v33, %v1451_v12  ;;  %v1453_v40 = vsel %vm481_vm7, %v1451_v12, %v1449_v33  ;;  %v1446_v33 = vadd.f32 %v1444_v9, %v1424_v3 }
 0x1d2   : > { %v1466_v7 = vmul.f32 %v1459_v14, %v1452_v22  ;;  %v1467_v28 = vmul.f32 %v1463_v20, %v1453_v40 }
 0x1d3   : > { %v1149_v23 = vpop.permute.xlu0 %1148 }
 0x1d4   : > { %v1151_v21 = vpop.permute.xlu1 %1150  ;;  %v1468_v14 = vadd.f32 %v1466_v7, %v1446_v33  ;;  %v1469_v20 = vadd.f32 %v1467_v28, %v1447_v6 }
 0x1d5   : > { %v1152_v15 = vsel %vm505_vm8, %v1149_v23, %v1151_v21  ;;  %v1153_v50 = vsel %vm505_vm8, %v1151_v21, %v1149_v23 }
 0x1d6   : > { %v1166_v63 = vmul.f32 %v1159_v0, %v1152_v15  ;;  %v1167_v2 = vmul.f32 %v1163_v19, %v1153_v50 }
 0x1d7   : > { %v1471_v39 = vpop.permute.xlu0 %1470 }
 0x1d8   : > { %v1473_v18 = vpop.permute.xlu1 %1472  ;;  %v1168_v38 = vadd.f32 %v1166_v63, %v1146_v25  ;;  %v1169_v12 = vadd.f32 %v1167_v2, %v1147_v24 }
 0x1d9   : > { %v1474_v42 = vsel %vm505_vm8, %v1471_v39, %v1473_v18  ;;  %v1475_v61 = vsel %vm505_vm8, %v1473_v18, %v1471_v39 }
 0x1da   : > { %v1488_v29 = vmul.f32 %v1481_v36, %v1474_v42  ;;  %v1489_v47 = vmul.f32 %v1485_v46, %v1475_v61 }
 0x1db   : > { %v1171_v10 = vpop.permute.xlu0 %1170 }
 0x1dc   : > { %v1173_v59 = vpop.permute.xlu1 %1172  ;;  %v1490_v54 = vadd.f32 %v1488_v29, %v1468_v14  ;;  %v1491_v23 = vadd.f32 %v1489_v47, %v1469_v20 }
 0x1dd   : > { %v1174_v44 = vsel %vm529_vm9, %v1171_v10, %v1173_v59  ;;  %v1175_v45 = vsel %vm529_vm9, %v1173_v59, %v1171_v10 }
 0x1de   : > { %v1188_v58 = vmul.f32 %v1181_v43, %v1174_v44  ;;  %v1189_v17 = vmul.f32 %v1185_v35, %v1175_v45 }
 0x1df   : > { %v1493_v51 = vpop.permute.xlu0 %1492 }
 0x1e0   : > { %v1190_v55 = vadd.f32 %v1188_v58, %v1168_v38  ;;  %v1191_v31 = vadd.f32 %v1189_v17, %v1169_v12  ;;  %v1495_v0 = vpop.permute.xlu1 %1494 }
 0x1e1   : > { %v1496_v19 = vsel %vm529_vm9, %v1493_v51, %v1495_v0  ;;  %v1497_v37 = vsel %vm529_vm9, %v1495_v0, %v1493_v51 }
 0x1e2   : > { %1663 = vst [vmem:[%s2404_s20 + $0x20] sm:$0xff] %v1190_v55  ;;  %1664 = vst [vmem:[%s2404_s20 + $0x28] sm:$0xff] %v1191_v31  ;;  %v1510_v36 = vmul.f32 %v1503_v13, %v1496_v19  ;;  %v1511_v46 = vmul.f32 %v1507_v56, %v1497_v37 }
 0x1e4   : > { %v1512_v57 = vadd.f32 %v1510_v36, %v1490_v54  ;;  %v1513_v41 = vadd.f32 %v1511_v46, %v1491_v23 }
 0x1e6   : > { %1685 = vst [vmem:[%s2404_s20 + $0x30] sm:$0xff] %v1512_v57  ;;  %1686 = vst [vmem:[%s2404_s20 + $0x38] sm:$0xff] %v1513_v41 }
 0x1e7   : > { %1762 = shalt.err (!%p1759_p3)
}
 0x1e8   : > { %s1763_s17 = scalar_lea.hbm %s2669_s8, 1024  ;;  %s1767_s25 = scalar_lea.hbm %s2722_s3, 2048 }
 0x1e9   : > { %p1764_p4 = scmp.ne.s32.totalorder %s2669_s8, %s1763_s17  ;;  %p1768_p9 = scmp.lt.u32.totalorder %s2669_s8, %s2722_s3 }
 0x1ea   : > { %p1769_p10 = scmp.lt.u32.totalorder %s1767_s25, %s1763_s17  ;;  %p1771_p12 = scmp.lt.u32.totalorder %s1763_s17, %s2669_s8 }
 0x1eb   : > { %p1765_p7 = pnand %p1764_p4, %p1882_p5 }
 0x1ec   : > { %p1770_p11 = por %p1769_p10, %p1768_p9 }
 0x1ed   : > { %p1766_p8 = pneg %p1765_p7 }
 0x1ee   : > { %p1772_p13 = por %p1771_p12, %p1770_p11 }
 0x1f0   : > { %p1773_p0 = pnand %p1772_p13, %p1766_p8 }
 0x1f2   : > { %1776 = shalt.err (!%p1773_p0)
}
 0x1f3   : > { %s1823_s28 = smov 256  }
 0x1f4   : > { %1696 = dma.vmem_to_hbm [thread:$0]  (%p1882_p5), %s2671_s5, 1024, %s2669_s8, %s2677_s16, %s1823_s28, %s1823_s28, %s1815_s30  }
 0x1f5 PF: > { %p1702_p1 = scmp.ge.s32.totalorder %s1811_s15, 2  ;;  %s1547_s29 = sand.u32 1, %s1799_s12  }
 0x1f6   : > { %s1548_s4 = scalar_lea.sflag [#allocation3], %s1547_s29 }
 0x1f7   : > { %p1699_p2 = pnand %p1702_p1, %p1886_p6 }
 0x1f9   : > { %1794 = dma.done.wait (!%p1699_p2), %s1548_s4, 1024  }
 0x1fa   : > { %1796 = vsyncadd (!%p1699_p2), %s1548_s4, 4294966272  ;;  %p13_p3 = scmp.ge.s32.totalorder %s1869_s18, 4   ;;  %s2725_s12 = smov %s1803_s13 }
 0x1fb   : > { %s2726_s13 = smov %s1807_s14  ;;  %s2727_s14 = smov %s1880_s21 }
 0x1fc   : > { %s2728_s15 = smov %s1869_s18  ;;  %15 = sbr.rel (!%p13_p3) target bundleno = 3 (0x3), region = 81 }
 0x203   :  { %1553 = vsyncpa [#allocation3], 1 }
 0x204   :  { %1555 = vsyncpa [#allocation3 + $0x1], 1 }

</bundles_post_ra>
